<compile_context>
chip_gen: v7x
topology: tpu7x:2x2x1
jax: 0.10.0
libtpu: 0.0.40
codegen_flags: <defaults>
</compile_context>

<pallas_src>
import functools

import jax
import jax.numpy as jnp
from jax import lax
from jax.experimental import pallas as pl
from jax.experimental.pallas import tpu as pltpu

LANE = 128


def _round_up(n, m):
    return ((n + m - 1) // m) * m


# ---------------------------------------------------------------------------
# Kernel
# ---------------------------------------------------------------------------
def _deepfm_kernel(field_specs, h1p, dp,
                   x_ref, gmat_ref, b1_ref, w2_ref, b2_ref, w3_ref, bias_ref,
                   out_ref, sel_ref):
    """One batch tile.

    field_specs: static tuple of (column_offset, padded_width) per field; both
    are multiples of 128 so the per-field selector stores are unmasked and the
    corresponding gather-matrix row blocks are tile-aligned.
    """
    tb = x_ref.shape[0]

    # Multi-hot selector, built per field into 128-aligned VMEM slabs.  Each
    # field compares only against its own padded vocab block (field-local ids),
    # so VPU work is ~F x smaller than a full-width compare per field and there
    # is no serial add chain.  Padded columns compare unequal -> exact zeros.
    for f, (coff, vpad) in enumerate(field_specs):
        col = lax.broadcasted_iota(jnp.int32, (tb, vpad), 1)
        sel_ref[:, coff:coff + vpad] = (col == x_ref[:, f:f + 1]).astype(jnp.float32)

    # Single fused gather matmul.  gmat columns (all 128-aligned segments):
    #   [0 : h1p)            per-field  emb @ w1_f   -> layer-1 pre-activation
    #   [h1p : h1p+dp)       emb                     -> sum_f e        (FM)
    #   [h1p+dp : h1p+dp+128) lin - 0.5*||e||^2      -> first-order + sq-sum
    r = jnp.dot(sel_ref[...], gmat_ref[...], preferred_element_type=jnp.float32)

    # Deep MLP (w1/b1 folded into gmat; BN/Dropout are eval-mode identity).
    # Padded lanes stay exactly zero through ReLU and the zero-padded weights.
    h1 = jnp.maximum(r[:, :h1p] + b1_ref[...], 0.0)
    h2 = jnp.maximum(
        jnp.dot(h1, w2_ref[...], preferred_element_type=jnp.float32) + b2_ref[...],
        0.0)
    # N=1 head: VPU multiply + cross-lane reduce, keeps the MXU free.
    deep = jnp.sum(h2 * w3_ref[...], axis=1, keepdims=True)

    # FM second order: 0.5*||sum_f e||^2 ; the "-0.5*sum_f||e||^2" part and the
    # first-order term were folded into the last gmat segment (zeros elsewhere).
    sum_e = r[:, h1p:h1p + dp]
    fm2 = 0.5 * jnp.sum(sum_e * sum_e, axis=1, keepdims=True)
    fm1 = jnp.sum(r[:, h1p + dp:], axis=1, keepdims=True)

    # TODO(synk): a lane-dense (1, tb) output block would replace the masked
    #             (tb, 1) stores; the absolute win is tiny for a 4-byte/row
    #             output so the simple layout is kept.
    out_ref[...] = jax.nn.sigmoid(fm2 + fm1 + deep + bias_ref[0, 0])


# ---------------------------------------------------------------------------
# One-time parameter preparation (per checkpoint) — kept out of the hot path.
# ---------------------------------------------------------------------------
def prepare_deepfm(params, feature_dims):
    emb = params["emb_table"].astype(jnp.float32)        # [total, D]
    lin = params["lin_table"].astype(jnp.float32)        # [total]
    w1, b1 = params["w1"], params["b1"]
    w2, b2 = params["w2"], params["b2"]
    w3, b3 = params["w3"], params["b3"]

    total, D = emb.shape
    F = len(feature_dims)
    H1, H2 = w1.shape[1], w2.shape[1]
    h1p, dp, h2p = _round_up(H1, LANE), _round_up(D, LANE), _round_up(H2, LANE)
    width = h1p + dp + LANE

    goff = [0]
    for v in feature_dims:
        goff.append(goff[-1] + v)
    vpads = [_round_up(v, LANE) for v in feature_dims]
    roff = [0]
    for v in vpads:
        roff.append(roff[-1] + v)
    fxt = roff[-1]

    gmat = jnp.zeros((fxt, width), jnp.float32)
    for f in range(F):
        v = feature_dims[f]
        rows = emb[goff[f]:goff[f] + v]                   # [v, D]
        lin_f = lin[goff[f]:goff[f] + v]                  # [v]
        blk = jnp.zeros((vpads[f], width), jnp.float32)
        blk = blk.at[:v, :H1].set(
            jnp.dot(rows, w1[f * D:(f + 1) * D, :], precision="highest"))
        blk = blk.at[:v, h1p:h1p + D].set(rows)
        blk = blk.at[:v, h1p + dp].set(lin_f - 0.5 * jnp.sum(rows * rows, axis=1))
        gmat = gmat.at[roff[f]:roff[f] + vpads[f], :].set(blk)

    def _pad2(a, rows, cols):
        out = jnp.zeros((rows, cols), jnp.float32)
        return out.at[:a.shape[0], :a.shape[1]].set(a)

    return {
        "gmat": gmat,
        "b1p": _pad2(b1.reshape(1, -1), 1, h1p),
        "w2p": _pad2(w2, h1p, h2p),
        "b2p": _pad2(b2.reshape(1, -1), 1, h2p),
        "w3p": _pad2(w3.reshape(1, -1), 1, h2p),
        "head_bias": (params["lin_bias"] + b3).reshape(1, 1).astype(jnp.float32),
        "field_specs": tuple((roff[f], vpads[f]) for f in range(F)),
        "h1p": h1p, "dp": dp, "h2p": h2p,
    }


# ---------------------------------------------------------------------------
# Forward wrapper
# ---------------------------------------------------------------------------
def deepfm_forward(x, prep, *, tb=1024):
    """x: [B, F] int32 field-local categorical indices. Returns [B] float32."""
    B, F = x.shape
    gmat = prep["gmat"]
    fxt, width = gmat.shape
    h1p, dp, h2p = prep["h1p"], prep["dp"], prep["h2p"]

    resident = 4 * (gmat.size + prep["b1p"].size + prep["w2p"].size
                    + prep["b2p"].size + prep["w3p"].size)
    # TODO(synk): for production vocabularies where the fused gather matrix no
    #             longer fits VMEM (budget ~64 MiB on v7x; earlier MXU-roofline
    #             crossover on v5e), fall back to a scalar-prefetch / manual
    #             make_async_copy row-gather path instead of failing.
    if resident > (44 << 20):
        raise NotImplementedError(
            "fused gather matrix too large for the VMEM-resident path")

    # Per-batch-row VMEM bytes: double-buffered idx + out tiles (lane-padded to
    # 128), selector scratch, and headroom for r / h1 / h2 temporaries.
    row_bytes = 4 * (2 * LANE + 2 * LANE + fxt + width + h1p + 2 * h2p)
    tb_budget = max(8, ((44 << 20) - resident) // row_bytes // 8 * 8)
    tb = max(8, min(tb, tb_budget, _round_up(B, 8)))
    if B > 8:
        # Keep >= 2 grid steps so the "parallel" batch axis feeds both v7x TCs.
        tb = min(tb, _round_up((_round_up(B, 8) + 1) // 2, 8))

    bp = _round_up(B, tb)
    xi = x.astype(jnp.int32)
    if bp != B:
        # Padded rows select row 0 of every field block; they produce finite
        # bogus scores that are sliced off below — do not "fix" this to -inf.
        xi = jnp.pad(xi, ((0, bp - B), (0, 0)))

    vmem_limit = int(min(64 << 20,
                         max(32 << 20, resident + tb * row_bytes + (8 << 20))))

    def _resident_spec(a):                               # stays in VMEM across grid
        return pl.BlockSpec(a.shape, lambda i: (0, 0))

    grid_spec = pltpu.PrefetchScalarGridSpec(
        num_scalar_prefetch=0,
        grid=(bp // tb,),
        in_specs=[
            pl.BlockSpec((tb, F), lambda i: (i, 0)),     # streamed index tile
            _resident_spec(gmat), _resident_spec(prep["b1p"]),
            _resident_spec(prep["w2p"]), _resident_spec(prep["b2p"]),
            _resident_spec(prep["w3p"]),
            pl.BlockSpec(memory_space=pltpu.MemorySpace.SMEM),   # folded bias
        ],
        out_specs=pl.BlockSpec((tb, 1), lambda i: (i, 0)),
        scratch_shapes=[pltpu.VMEM((tb, fxt), jnp.float32)],     # selector slab
    )

    out = pl.pallas_call(
        functools.partial(_deepfm_kernel, prep["field_specs"], h1p, dp),
        out_shape=jax.ShapeDtypeStruct((bp, 1), jnp.float32),
        grid_spec=grid_spec,
        compiler_params=pltpu.CompilerParams(
            dimension_semantics=("parallel",),           # v7x: shard batch over 2 TCs
            vmem_limit_bytes=vmem_limit),
    )(xi, gmat, prep["b1p"], prep["w2p"], prep["b2p"], prep["w3p"],
      prep["head_bias"])
    return out[:B, 0]                                    # .squeeze(1)


# ---------------------------------------------------------------------------
# Pure-JAX reference (matches the PyTorch forward with sigmoid=True)
# ---------------------------------------------------------------------------
def deepfm_reference(x, params):
    idx = x + params["offsets"][None, :]
    e = params["emb_table"][idx]                         # [B, F, D]
    lin = params["lin_table"][idx]                       # [B, F]
    sum_f = e.sum(axis=1)
    fm2 = 0.5 * jnp.sum(sum_f * sum_f - (e * e).sum(axis=1), axis=1)
    fm1 = lin.sum(axis=1) + params["lin_bias"][0, 0]
    h = e.reshape(e.shape[0], -1)
    h = jnp.maximum(h @ params["w1"] + params["b1"], 0.0)
    h = jnp.maximum(h @ params["w2"] + params["b2"], 0.0)
    deep = (h @ params["w3"] + params["b3"])[:, 0]
    return jax.nn.sigmoid(fm2 + fm1 + deep)


def init_params(feature_dims, embed_dim, hidden_dims, key):
    total = sum(feature_dims)
    F = len(feature_dims)
    k = jax.random.split(key, 5)
    offsets = jnp.concatenate(
        [jnp.zeros((1,), jnp.int32),
         jnp.cumsum(jnp.array(feature_dims, jnp.int32))[:-1]])
    return {
        "emb_table": 0.1 * jax.random.normal(k[0], (total, embed_dim), jnp.float32),
        "lin_table": 0.1 * jax.random.normal(k[1], (total,), jnp.float32),
        "lin_bias": jnp.zeros((1, 1), jnp.float32),
        "w1": 0.1 * jax.random.normal(k[2], (embed_dim * F, hidden_dims[0]), jnp.float32),
        "b1": jnp.zeros((1, hidden_dims[0]), jnp.float32),
        "w2": 0.1 * jax.random.normal(k[3], (hidden_dims[0], hidden_dims[1]), jnp.float32),
        "b2": jnp.zeros((1, hidden_dims[1]), jnp.float32),
        "w3": 0.1 * jax.random.normal(k[4], (hidden_dims[1], 1), jnp.float32),
        "b3": jnp.zeros((1, 1), jnp.float32),
        "offsets": offsets,
    }


if __name__ == "__main__":
    feature_dims = (10, 20, 30, 40)   # vocab size per categorical field
    embed_dim = 8
    hidden_dims = (32, 16)
    B = 256
    F = len(feature_dims)

    key = jax.random.PRNGKey(0)
    pkey, xkey = jax.random.split(key)
    params = init_params(feature_dims, embed_dim, hidden_dims, pkey)
    prep = prepare_deepfm(params, feature_dims)          # one-time fusion

    xkeys = jax.random.split(xkey, F)
    x = jnp.stack(
        [jax.random.randint(xkeys[f], (B,), 0, feature_dims[f], dtype=jnp.int32)
         for f in range(F)],
        axis=1)                                          # [B, F] int32

    out = deepfm_forward(x, prep)                        # tb auto-clamps -> grid of 2
    jax.block_until_ready(out)
    assert out.shape == (B,) and out.dtype == jnp.float32

    ref = deepfm_reference(x, params)
    err = float(jnp.max(jnp.abs(out - ref)))
    assert err < 1e-4, f"kernel/reference mismatch: {err}"
    print("KERNEL_OK")
</pallas_src>

<mosaic_0001>
module attributes {stable_mosaic.version = 11 : i64} {
  func.func @_deepfm_kernel(%arg0: i32, %arg1: memref<128x4xi32, #tpu.memory_space<vmem>>, %arg2: memref<512x384xf32, #tpu.memory_space<vmem>>, %arg3: memref<1x128xf32, #tpu.memory_space<vmem>>, %arg4: memref<128x128xf32, #tpu.memory_space<vmem>>, %arg5: memref<1x128xf32, #tpu.memory_space<vmem>>, %arg6: memref<1x128xf32, #tpu.memory_space<vmem>>, %arg7: memref<1x1xf32, #tpu.memory_space<smem>>, %arg8: memref<128x1xf32, #tpu.memory_space<vmem>>, %arg9: memref<128x512xf32, #tpu.memory_space<vmem>>) attributes {dimension_semantics = [#tpu.dimension_semantics<parallel>], iteration_bounds = array<i64: 2>, scalar_prefetch = 0 : i64, scratch_operands = 1 : i64, tpu.core_type = #tpu.core_type<tc>, window_params = [{transform_indices = @transform_0, window_bounds = array<i64: 128, 4>}, {pipeline_mode = #tpu.pipeline_mode<synchronous>, transform_indices = @transform_1, window_bounds = array<i64: 512, 384>}, {pipeline_mode = #tpu.pipeline_mode<synchronous>, transform_indices = @transform_2, window_bounds = array<i64: 1, 128>}, {pipeline_mode = #tpu.pipeline_mode<synchronous>, transform_indices = @transform_3, window_bounds = array<i64: 128, 128>}, {pipeline_mode = #tpu.pipeline_mode<synchronous>, transform_indices = @transform_4, window_bounds = array<i64: 1, 128>}, {pipeline_mode = #tpu.pipeline_mode<synchronous>, transform_indices = @transform_5, window_bounds = array<i64: 1, 128>}, {transform_indices = @transform_6, window_bounds = array<i64: 1, 1>}, {transform_indices = @transform_7, window_bounds = array<i64: 128, 1>}]} {
    %0 = tpu.iota {dimensions = array<i32: 1>} : vector<128x128xi32>
    %c0 = arith.constant 0 : index
    %c0_0 = arith.constant 0 : index
    %1 = vector.load %arg1[%c0, %c0_0] : memref<128x4xi32, #tpu.memory_space<vmem>>, vector<128x1xi32>
    %2 = vector.broadcast %1 : vector<128x1xi32> to vector<128x128xi32>
    %3 = arith.cmpi eq, %0, %2 : vector<128x128xi32>
    %4 = arith.extui %3 : vector<128x128xi1> to vector<128x128xi32>
    %5 = arith.sitofp %4 : vector<128x128xi32> to vector<128x128xf32>
    %c0_1 = arith.constant 0 : index
    %c0_2 = arith.constant 0 : index
    %6 = vector.load %arg9[%c0_1, %c0_2] : memref<128x512xf32, #tpu.memory_space<vmem>>, vector<128x128xf32>
    tpu.vector_store %arg9[%c0_1, %c0_2], %5 {strides = array<i32>} : memref<128x512xf32, #tpu.memory_space<vmem>>, vector<128x128xf32>,
    %7 = tpu.iota {dimensions = array<i32: 1>} : vector<128x128xi32>
    %c0_3 = arith.constant 0 : index
    %c1 = arith.constant 1 : index
    %8 = vector.load %arg1[%c0_3, %c1] : memref<128x4xi32, #tpu.memory_space<vmem>>, vector<128x1xi32>
    %9 = vector.broadcast %8 : vector<128x1xi32> to vector<128x128xi32>
    %10 = arith.cmpi eq, %7, %9 : vector<128x128xi32>
    %11 = arith.extui %10 : vector<128x128xi1> to vector<128x128xi32>
    %12 = arith.sitofp %11 : vector<128x128xi32> to vector<128x128xf32>
    %c0_4 = arith.constant 0 : index
    %c128 = arith.constant 128 : index
    %13 = vector.load %arg9[%c0_4, %c128] : memref<128x512xf32, #tpu.memory_space<vmem>>, vector<128x128xf32>
    tpu.vector_store %arg9[%c0_4, %c128], %12 {strides = array<i32>} : memref<128x512xf32, #tpu.memory_space<vmem>>, vector<128x128xf32>,
    %14 = tpu.iota {dimensions = array<i32: 1>} : vector<128x128xi32>
    %c0_5 = arith.constant 0 : index
    %c2 = arith.constant 2 : index
    %15 = vector.load %arg1[%c0_5, %c2] : memref<128x4xi32, #tpu.memory_space<vmem>>, vector<128x1xi32>
    %16 = vector.broadcast %15 : vector<128x1xi32> to vector<128x128xi32>
    %17 = arith.cmpi eq, %14, %16 : vector<128x128xi32>
    %18 = arith.extui %17 : vector<128x128xi1> to vector<128x128xi32>
    %19 = arith.sitofp %18 : vector<128x128xi32> to vector<128x128xf32>
    %c0_6 = arith.constant 0 : index
    %c256 = arith.constant 256 : index
    %20 = vector.load %arg9[%c0_6, %c256] : memref<128x512xf32, #tpu.memory_space<vmem>>, vector<128x128xf32>
    tpu.vector_store %arg9[%c0_6, %c256], %19 {strides = array<i32>} : memref<128x512xf32, #tpu.memory_space<vmem>>, vector<128x128xf32>,
    %21 = tpu.iota {dimensions = array<i32: 1>} : vector<128x128xi32>
    %c0_7 = arith.constant 0 : index
    %c3 = arith.constant 3 : index
    %22 = vector.load %arg1[%c0_7, %c3] : memref<128x4xi32, #tpu.memory_space<vmem>>, vector<128x1xi32>
    %23 = vector.broadcast %22 : vector<128x1xi32> to vector<128x128xi32>
    %24 = arith.cmpi eq, %21, %23 : vector<128x128xi32>
    %25 = arith.extui %24 : vector<128x128xi1> to vector<128x128xi32>
    %26 = arith.sitofp %25 : vector<128x128xi32> to vector<128x128xf32>
    %c0_8 = arith.constant 0 : index
    %c384 = arith.constant 384 : index
    %27 = vector.load %arg9[%c0_8, %c384] : memref<128x512xf32, #tpu.memory_space<vmem>>, vector<128x128xf32>
    tpu.vector_store %arg9[%c0_8, %c384], %26 {strides = array<i32>} : memref<128x512xf32, #tpu.memory_space<vmem>>, vector<128x128xf32>,
    %c0_9 = arith.constant 0 : index
    %c0_10 = arith.constant 0 : index
    %28 = vector.load %arg9[%c0_9, %c0_10] : memref<128x512xf32, #tpu.memory_space<vmem>>, vector<128x512xf32>
    %c0_11 = arith.constant 0 : index
    %c0_12 = arith.constant 0 : index
    %29 = vector.load %arg2[%c0_11, %c0_12] : memref<512x384xf32, #tpu.memory_space<vmem>>, vector<512x384xf32>
    %cst = arith.constant dense<0.000000e+00> : vector<128x384xf32>
    %30 = tpu.matmul %28, %29, %cst {dimension_numbers = #tpu.dot_dimension_numbers<[1], [0], [0], [1], [0, 0, 1, 1], [], []>} : vector<128x512xf32>, vector<512x384xf32>, vector<128x384xf32> -> vector<128x384xf32>
    %31 = vector.extract_strided_slice %30 {offsets = [0, 0], sizes = [128, 128], strides = [1, 1]} : vector<128x384xf32> to vector<128x128xf32>
    %c0_13 = arith.constant 0 : index
    %c0_14 = arith.constant 0 : index
    %32 = vector.load %arg3[%c0_13, %c0_14] : memref<1x128xf32, #tpu.memory_space<vmem>>, vector<1x128xf32>
    %33 = vector.broadcast %32 : vector<1x128xf32> to vector<128x128xf32>
    %34 = arith.addf %31, %33 : vector<128x128xf32>
    %cst_15 = arith.constant 0.000000e+00 : f32
    %35 = vector.broadcast %cst_15 : f32 to vector<128x128xf32>
    %36 = arith.maximumf %34, %35 : vector<128x128xf32>
    %c0_16 = arith.constant 0 : index
    %c0_17 = arith.constant 0 : index
    %37 = vector.load %arg4[%c0_16, %c0_17] : memref<128x128xf32, #tpu.memory_space<vmem>>, vector<128x128xf32>
    %cst_18 = arith.constant dense<0.000000e+00> : vector<128x128xf32>
    %38 = tpu.matmul %36, %37, %cst_18 {dimension_numbers = #tpu.dot_dimension_numbers<[1], [0], [0], [1], [0, 0, 1, 1], [], []>} : vector<128x128xf32>, vector<128x128xf32>, vector<128x128xf32> -> vector<128x128xf32>
    %c0_19 = arith.constant 0 : index
    %c0_20 = arith.constant 0 : index
    %39 = vector.load %arg5[%c0_19, %c0_20] : memref<1x128xf32, #tpu.memory_space<vmem>>, vector<1x128xf32>
    %40 = vector.broadcast %39 : vector<1x128xf32> to vector<128x128xf32>
    %41 = arith.addf %38, %40 : vector<128x128xf32>
    %cst_21 = arith.constant 0.000000e+00 : f32
    %42 = vector.broadcast %cst_21 : f32 to vector<128x128xf32>
    %43 = arith.maximumf %41, %42 : vector<128x128xf32>
    %c0_22 = arith.constant 0 : index
    %c0_23 = arith.constant 0 : index
    %44 = vector.load %arg6[%c0_22, %c0_23] : memref<1x128xf32, #tpu.memory_space<vmem>>, vector<1x128xf32>
    %45 = vector.broadcast %44 : vector<1x128xf32> to vector<128x128xf32>
    %46 = arith.mulf %43, %45 : vector<128x128xf32>
    %cst_24 = arith.constant dense<0.000000e+00> : vector<128xf32>
    %47 = vector.multi_reduction <add>, %46, %cst_24 [1] : vector<128x128xf32> to vector<128xf32>
    %48 = vector.shape_cast %47 : vector<128xf32> to vector<128x1xf32>
    %49 = vector.extract_strided_slice %30 {offsets = [0, 128], sizes = [128, 128], strides = [1, 1]} : vector<128x384xf32> to vector<128x128xf32>
    %50 = arith.mulf %49, %49 : vector<128x128xf32>
    %cst_25 = arith.constant dense<0.000000e+00> : vector<128xf32>
    %51 = vector.multi_reduction <add>, %50, %cst_25 [1] : vector<128x128xf32> to vector<128xf32>
    %52 = vector.shape_cast %51 : vector<128xf32> to vector<128x1xf32>
    %cst_26 = arith.constant 5.000000e-01 : f32
    %53 = vector.broadcast %cst_26 : f32 to vector<128x1xf32>
    %54 = arith.mulf %53, %52 : vector<128x1xf32>
    %55 = vector.extract_strided_slice %30 {offsets = [0, 256], sizes = [128, 128], strides = [1, 1]} : vector<128x384xf32> to vector<128x128xf32>
    %cst_27 = arith.constant dense<0.000000e+00> : vector<128xf32>
    %56 = vector.multi_reduction <add>, %55, %cst_27 [1] : vector<128x128xf32> to vector<128xf32>
    %57 = vector.shape_cast %56 : vector<128xf32> to vector<128x1xf32>
    %58 = arith.addf %54, %57 : vector<128x1xf32>
    %59 = arith.addf %58, %48 : vector<128x1xf32>
    %c0_28 = arith.constant 0 : index
    %c0_29 = arith.constant 0 : index
    %60 = memref.load %arg7[%c0_28, %c0_29] : memref<1x1xf32, #tpu.memory_space<smem>>
    %61 = vector.broadcast %60 : f32 to vector<128x1xf32>
    %62 = arith.addf %59, %61 : vector<128x1xf32>
    %63 = arith.negf %62 : vector<128x1xf32>
    %64 = math.exp %63 : vector<128x1xf32>
    %cst_30 = arith.constant 1.000000e+00 : f32
    %65 = vector.broadcast %cst_30 : f32 to vector<128x1xf32>
    %66 = arith.addf %65, %64 : vector<128x1xf32>
    %67 = arith.divf %65, %66 : vector<128x1xf32>
    %c0_31 = arith.constant 0 : index
    %c0_32 = arith.constant 0 : index
    %68 = vector.load %arg8[%c0_31, %c0_32] : memref<128x1xf32, #tpu.memory_space<vmem>>, vector<128x1xf32>
    tpu.vector_store %arg8[%c0_31, %c0_32], %67 {strides = array<i32>} : memref<128x1xf32, #tpu.memory_space<vmem>>, vector<128x1xf32>,
    return
  }
  func.func @transform_0(%arg0: i32) -> (i32, i32) {
    %c0_i32 = arith.constant 0 : i32
    %c0_i32_0 = arith.constant 0 : i32
    return %arg0, %c0_i32 : i32, i32
  }
  func.func @transform_1(%arg0: i32) -> (i32, i32) {
    %c0_i32 = arith.constant 0 : i32
    %c0_i32_0 = arith.constant 0 : i32
    %c0_i32_1 = arith.constant 0 : i32
    return %c0_i32, %c0_i32_0 : i32, i32
  }
  func.func @transform_2(%arg0: i32) -> (i32, i32) {
    %c0_i32 = arith.constant 0 : i32
    %c0_i32_0 = arith.constant 0 : i32
    %c0_i32_1 = arith.constant 0 : i32
    return %c0_i32, %c0_i32_0 : i32, i32
  }
  func.func @transform_3(%arg0: i32) -> (i32, i32) {
    %c0_i32 = arith.constant 0 : i32
    %c0_i32_0 = arith.constant 0 : i32
    %c0_i32_1 = arith.constant 0 : i32
    return %c0_i32, %c0_i32_0 : i32, i32
  }
  func.func @transform_4(%arg0: i32) -> (i32, i32) {
    %c0_i32 = arith.constant 0 : i32
    %c0_i32_0 = arith.constant 0 : i32
    %c0_i32_1 = arith.constant 0 : i32
    return %c0_i32, %c0_i32_0 : i32, i32
  }
  func.func @transform_5(%arg0: i32) -> (i32, i32) {
    %c0_i32 = arith.constant 0 : i32
    %c0_i32_0 = arith.constant 0 : i32
    %c0_i32_1 = arith.constant 0 : i32
    return %c0_i32, %c0_i32_0 : i32, i32
  }
  func.func @transform_6(%arg0: i32) -> (i32, i32) {
    %c0_i32 = arith.constant 0 : i32
    %c0_i32_0 = arith.constant 0 : i32
    %c0_i32_1 = arith.constant 0 : i32
    return %c0_i32, %c0_i32_0 : i32, i32
  }
  func.func @transform_7(%arg0: i32) -> (i32, i32) {
    %c0_i32 = arith.constant 0 : i32
    %c0_i32_0 = arith.constant 0 : i32
    return %arg0, %c0_i32 : i32, i32
  }
}

</mosaic_0001>

<bundles_post_ra>
// kernel: tpu_custom_call.1
= control target key start
LH: loop header
LB: loop body
LE: loop exit
PB: predicated region body
PF: predicated region fallthrough
CT: control target
= control target key end

     0   :  { %s3922_s0 = inlined_call_operand.vmem [shape: s32[256,4], index: 0, kind: input, shape index: {}]   ;;  %s3923_s1 = inlined_call_operand.hbm [shape: f32[512,384], index: 1, kind: input, shape index: {}]   ;;  %s3924_s2 = inlined_call_operand.vmem [shape: f32[1,128], index: 2, kind: input, shape index: {}]   ;;  %s3925_s3 = inlined_call_operand.vmem [shape: f32[128,128], index: 3, kind: input, shape index: {}]   ;;  %s3926_s4 = inlined_call_operand.vmem [shape: f32[1,128], index: 4, kind: input, shape index: {}]   ;;  %s3927_s5 = inlined_call_operand.vmem [shape: f32[1,128], index: 5, kind: input, shape index: {}]   ;;  %s3928_s6 = inlined_call_operand.<no memory space> [shape: f32[1,1], index: 6, kind: input, shape index: {}]   ;;  %s3929_s7 = inlined_call_operand.vmem [shape: f32[256,1], index: 7, kind: output, shape index: {}]  }
   0x1   :  { %12 = sst [smem:[#allocation3]] %s3928_s6 }
   0x2   :  { %13 = vsyncpa [#allocation5], 0  ;;  %s3219_s26 = smov 0  }
   0x3 LB: > { %s2285_s27 = sadd.s32 4294967295, %s3166_s26   ;;  %p2287_p0 = scmp.ge.s32.totalorder %s3166_s26, 1  ;;  %s3166_s26 = sphi %s3219_s26, %s19_s26  }
   0x4   : > { %p202_p1 = scmp.lt.s32.totalorder %s3166_s26, 3  ;;  %s3168_s28 = smov [#allocation4]  }
   0x5   : > { %s214_s29 = sshll.u32 %s3168_s28, 4  ;;  %p3233_p3 = scmp.eq.s32.totalorder %s2285_s27, 0  ;;  %s215_s29 = int_to_ptr.vmem [resolvable:$true] %s214_s29 }
   0x6   : > { %p3227_p2 = pnand %p2287_p0, %p202_p1  ;;  %s3128_s11 = scalar_lea.hbm %s3923_s1, 24576 }
   0x7   : > { %s3934_s6 = scalar_select %p3233_p3, 1, 0 }
   0x8   : > { %s3933_s30 = scalar_select %p3227_p2, 1, 0 }
   0x9   : > { %p3017_p4 = pneg %p3227_p2  ;;  %p3129_p6 = scmp.ne.s32.totalorder %s3923_s1, %s3128_s11 }
   0xa   : > { %p3135_p10 = scmp.lt.u32.totalorder %s3128_s11, %s3923_s1 }
   0xb   : > { %p3241_p5 = pnand %p3233_p3, %p3017_p4 }
   0xd   : > { %p3130_p7 = pneg %p3241_p5 }
   0xf   : > { %p3131_p8 = pnand %p3130_p7, %p3129_p6 }
  0x11   : > { %p3132_p9 = pneg %p3131_p8 }
  0x13   : > { %p3137_p11 = pnand %p3135_p10, %p3132_p9 }
  0x15   : > { %3140 = shalt.err (!%p3137_p11)
}
  0x16   : > { %s3141_s16 = scalar_lea.vmem %s215_s29, 24576  ;;  %p3149_p1 = scmp.lt.s32.totalorder %s215_s29, %s215_s29 }
  0x17   : > { %p3142_p12 = scmp.ne.s32.totalorder %s215_s29, %s3141_s16  ;;  %p3150_p4 = scmp.lt.s32.totalorder %s3141_s16, %s3141_s16 }
  0x19   : > { %p3144_p13 = pnand %p3142_p12, %p3130_p7  ;;  %p3151_p3 = por %p3150_p4, %p3149_p1 }
  0x1b   : > { %p3145_p0 = pneg %p3144_p13 }
  0x1d   : > { %p3152_p2 = pnand %p3151_p3, %p3145_p0 }
  0x1f   : > { %3155 = shalt.err (!%p3152_p2)
}
  0x20   : > { %s3169_s17 = smov 384   ;;  %s3170_s18 = smov 24  }
  0x21   : > { %3020 = dma.hbm_to_vmem [thread:$0]  (!%p3241_p5), %s3923_s1, 24576, %s215_s29, [#allocation5], %s3169_s17, %s3169_s17, %s3170_s18  }
  0x22   : > { %p3936_p6 = scmp.ne.s32.totalorder %s3933_s30, 0 }
  0x23   : > { %p3937_p8 = scmp.ne.s32.totalorder (!%p3936_p6), %s3934_s6, 0 }
  0x24   : > { %254 = sbr.rel (%p3936_p6) target bundleno = 947 (0x3b3), region = 48 }
  0x2b   : > { %3161 = dma.done.wait (%p3937_p8), [#allocation5], 24576  }
  0x2c   : > { %3163 = vsyncadd (%p3937_p8), [#allocation5], 4294942720  ;;  %s2292_s21 = sshll.u32 %s2285_s27, 4  ;;  %v3171_v0 = vmov 1   ;;  %v3172_v3 = vmov 0   ;;  %v877_v5 = vld [vmem:[#allocation4 + $0x8] sm:$0xff] }
  0x2d   : > { %3041 = vset.pattern.permute.xlu1 %v3171_v0  ;;  %3039 = vset.pattern.permute.xlu0 %v3171_v0  ;;  %p287_p2 = scmp.lt.s32.totalorder %s2292_s21, 31  ;;  %v880_v6 = vld [vmem:[#allocation4 + $0x20] sm:$0xff]  ;;  %v879_v9 = vld [vmem:[#allocation4 + $0x18] sm:$0xff]  ;;  %v886_v12 = vld [vmem:[#allocation4 + $0x50] sm:$0xff]  ;;  %s2086_s20 = sld [smem:[#allocation3]] }
  0x2e   : > { %v2757_v7 = vpack.c.bf16 %v880_v6, %v877_v5  ;;  %v876_v8 = vld [vmem:[#allocation4] sm:$0xff]  ;;  %v883_v10 = vld [vmem:[#allocation4 + $0x38] sm:$0xff]  ;;  %v882_v13 = vld [vmem:[#allocation4 + $0x30] sm:$0xff] }
  0x2f   : > { %s3939_s21 = smov (!%p287_p2, %s2292_s21), 31  ;;  %v2759_v11 = vpack.c.bf16 %v879_v9, %v876_v8  ;;  %v885_v14 = vld [vmem:[#allocation4 + $0x48] sm:$0xff]  ;;  %v2761_v15 = vpack.c.bf16 %v886_v12, %v883_v10  ;;  %v892_v17 = vld [vmem:[#allocation4 + $0x80] sm:$0xff]  ;;  %v891_v21 = vld [vmem:[#allocation4 + $0x78] sm:$0xff] }
  0x30   : > { %s2293_s22 = sshll.u32 %s3939_s21, 3  ;;  %2758 = vmatprep.subr.bf16.mxu0 %v2757_v7  ;;  %v889_v16 = vld [vmem:[#allocation4 + $0x68] sm:$0xff]  ;;  %v2763_v18 = vpack.c.bf16 %v885_v14, %v882_v13  ;;  %v888_v20 = vld [vmem:[#allocation4 + $0x60] sm:$0xff]  ;;  %v895_v23 = vld [vmem:[#allocation4 + $0x98] sm:$0xff] }
  0x31   : > { %s3277_s25 = scalar_lea.vmem %s3922_s0, %s2293_s22  ;;  %2760 = vmatpush1.bf16.msra.mxu0 %v2759_v11  ;;  %v2765_v19 = vpack.c.bf16 %v892_v17, %v889_v16  ;;  %v898_v24 = vld [vmem:[#allocation4 + $0xb0] sm:$0xff]  ;;  %v2767_v25 = vpack.c.bf16 %v891_v21, %v888_v20  ;;  %v897_v28 = vld [vmem:[#allocation4 + $0xa8] sm:$0xff]  ;;  %v904_v31 = vld [vmem:[#allocation4 + $0xe0] sm:$0xff] }
  0x32   : > { %v3280_v1 = vld [vmem:[%s3277_s25 + $0x8] sm:$0xff]  ;;  %v3283_v2 = vld [vmem:[%s3277_s25] sm:$0xff]  ;;  %v3288_v4 = vld [vmem:[%s3277_s25 + $0x10] sm:$0xff]  ;;  %2762 = vmatprep.subr.bf16.mxu0 %v2761_v15  ;;  %v2769_v26 = vpack.c.bf16 %v898_v24, %v895_v23 }
  0x33   : > { %448 = vperm.xlu1 %3041, %v3280_v1   ;;  %445 = vperm.xlu0 %3039, %v3283_v2   ;;  %v3295_v22 = vld [vmem:[%s3277_s25 + $0x18] sm:$0xff]  ;;  %v894_v27 = vld [vmem:[#allocation4 + $0x90] sm:$0xff]  ;;  %v3300_v29 = vld [vmem:[%s3277_s25 + $0x20] sm:$0xff] }
  0x34   : > { %v901_v30 = vld [vmem:[#allocation4 + $0xc8] sm:$0xff]  ;;  %v926_v32 = vld [vmem:[#allocation4 + $0x190] sm:$0xff]  ;;  %v2771_v34 = vpack.c.bf16 %v897_v28, %v894_v27  ;;  %v900_v35 = vld [vmem:[#allocation4 + $0xc0] sm:$0xff] }
  0x35   : > { %2764 = vmatpush1.bf16.msra.mxu0 %v2763_v18  ;;  %v3303_v33 = vld [vmem:[%s3277_s25 + $0x28] sm:$0xff]  ;;  %v903_v36 = vld [vmem:[#allocation4 + $0xd8] sm:$0xff]  ;;  %v2773_v38 = vpack.c.bf16 %v904_v31, %v901_v30  ;;  %v878_v41 = vld [vmem:[#allocation4 + $0x10] sm:$0xff] }
  0x36   : > { %2766 = vmatprep.subr.bf16.mxu0 %v2765_v19  ;;  %v929_v37 = vld [vmem:[#allocation4 + $0x1a8] sm:$0xff]  ;;  %v907_v39 = vld [vmem:[#allocation4 + $0xf8] sm:$0xff]  ;;  %v910_v43 = vld [vmem:[#allocation4 + $0x110] sm:$0xff]  ;;  %v2775_v50 = vpack.c.bf16 %v903_v36, %v900_v35 }
  0x37   : > { %3042 = vset.pattern.permute.xlu1 %v3172_v3  ;;  %3040 = vset.pattern.permute.xlu0 %v3172_v3  ;;  %v2885_v40 = vpack.c.bf16 %v929_v37, %v926_v32  ;;  %v881_v42 = vld [vmem:[#allocation4 + $0x28] sm:$0xff]  ;;  %v932_v45 = vld [vmem:[#allocation4 + $0x1c0] sm:$0xff]  ;;  %v935_v46 = vld [vmem:[#allocation4 + $0x1d8] sm:$0xff]  ;;  %v2777_v54 = vpack.c.bf16 %v910_v43, %v907_v39 }
  0x38   : > { %320 = vperm.xlu1 %3042, %v3280_v1   ;;  %317 = vperm.xlu0 %3040, %v3283_v2   ;;  %v2887_v44 = vpack.c.bf16 %v881_v42, %v878_v41  ;;  %v2889_v47 = vpack.c.bf16 %v935_v46, %v932_v45  ;;  %v884_v48 = vld [vmem:[#allocation4 + $0x40] sm:$0xff]  ;;  %v3308_v49 = vld [vmem:[%s3277_s25 + $0x30] sm:$0xff]  ;;  %v909_v52 = vld [vmem:[#allocation4 + $0x108] sm:$0xff] }
  0x39   : > { %2768 = vmatpush1.bf16.msra.mxu0 %v2767_v25  ;;  %2886 = vmatprep.subr.bf16.mxu1 %v2885_v40  ;;  %v906_v51 = vld [vmem:[#allocation4 + $0xf0] sm:$0xff]  ;;  %v887_v53 = vld [vmem:[#allocation4 + $0x58] sm:$0xff]  ;;  %v913_v55 = vld [vmem:[#allocation4 + $0x128] sm:$0xff] }
  0x3a   : > { %2770 = vmatprep.subr.bf16.mxu0 %v2769_v26  ;;  %2888 = vmatpush3.bf16.msra.mxu1 %v2887_v44  ;;  %v2891_v56 = vpack.c.bf16 %v887_v53, %v884_v48  ;;  %v938_v57 = vld [vmem:[#allocation4 + $0x1f0] sm:$0xff]  ;;  %v941_v58 = vld [vmem:[#allocation4 + $0x208] sm:$0xff]  ;;  %v916_v59 = vld [vmem:[#allocation4 + $0x140] sm:$0xff] }
  0x3b   : > { %2890 = vmatprep.subr.bf16.mxu1 %v2889_v47  ;;  %v2893_v60 = vpack.c.bf16 %v941_v58, %v938_v57  ;;  %v890_v61 = vld [vmem:[#allocation4 + $0x70] sm:$0xff]  ;;  %v893_v62 = vld [vmem:[#allocation4 + $0x88] sm:$0xff]  ;;  %v944_v63 = vld [vmem:[#allocation4 + $0x220] sm:$0xff]  ;;  %v2781_v7 = vpack.c.bf16 %v916_v59, %v913_v55 }
  0x3c   : > { %3043 = vset.pattern.permute.xlu1 %v3171_v0  ;;  %323 = vperm.xlu0 %3040, %v3288_v4   ;;  %v2779_v0 = vpack.c.bf16 %v909_v52, %v906_v51  ;;  %v912_v3 = vld [vmem:[#allocation4 + $0x120] sm:$0xff]  ;;  %v2895_v5 = vpack.c.bf16 %v893_v62, %v890_v61  ;;  %v947_v6 = vld [vmem:[#allocation4 + $0x238] sm:$0xff]  ;;  %v922_v13 = vld [vmem:[#allocation4 + $0x170] sm:$0xff] }
  0x3d   : > { %451 = vperm.xlu1 %3043, %v3288_v4   ;;  %2772 = vmatpush1.bf16.msra.mxu0 %v2771_v34  ;;  %v915_v8 = vld [vmem:[#allocation4 + $0x138] sm:$0xff]  ;;  %v896_v9 = vld [vmem:[#allocation4 + $0xa0] sm:$0xff]  ;;  %v2897_v14 = vpack.c.bf16 %v947_v6, %v944_v63  ;;  %v950_v15 = vld [vmem:[#allocation4 + $0x250] sm:$0xff] }
  0x3e   : > { %2774 = vmatprep.subr.bf16.mxu0 %v2773_v38  ;;  %2892 = vmatpush3.bf16.msra.mxu1 %v2891_v56  ;;  %v899_v10 = vld [vmem:[#allocation4 + $0xb8] sm:$0xff]  ;;  %v953_v16 = vld [vmem:[#allocation4 + $0x268] sm:$0xff]  ;;  %v2783_v17 = vpack.c.bf16 %v915_v8, %v912_v3  ;;  %v918_v18 = vld [vmem:[#allocation4 + $0x150] sm:$0xff] }
  0x3f   : > { %v3315_v11 = vld [vmem:[%s3277_s25 + $0x38] sm:$0xff]  ;;  %2894 = vmatprep.subr.bf16.mxu1 %v2893_v60  ;;  %v2899_v19 = vpack.c.bf16 %v899_v10, %v896_v9  ;;  %v921_v21 = vld [vmem:[#allocation4 + $0x168] sm:$0xff]  ;;  %v902_v23 = vld [vmem:[#allocation4 + $0xd0] sm:$0xff]  ;;  %v2901_v28 = vpack.c.bf16 %v953_v16, %v950_v15 }
  0x40   : > { %326 = vperm.xlu0 %3040, %v3295_v22   ;;  %v919_v12 = vld [vmem:[#allocation4 + $0x158] sm:$0xff]  ;;  %v905_v24 = vld [vmem:[#allocation4 + $0xe8] sm:$0xff]  ;;  %v3320_v25 = vld [vmem:[%s3277_s25 + $0x40] sm:$0xff]  ;;  %v2787_v32 = vpack.c.bf16 %v921_v21, %v918_v18 }
  0x41   : > { %454 = vperm.xlu1 %3043, %v3295_v22   ;;  %2776 = vmatpush1.bf16.msra.mxu0 %v2775_v50  ;;  %v2785_v20 = vpack.c.bf16 %v922_v13, %v919_v12  ;;  %v925_v26 = vld [vmem:[#allocation4 + $0x188] sm:$0xff]  ;;  %v928_v27 = vld [vmem:[#allocation4 + $0x1a0] sm:$0xff]  ;;  %v959_v31 = vld [vmem:[#allocation4 + $0x298] sm:$0xff]  ;;  %v2903_v35 = vpack.c.bf16 %v905_v24, %v902_v23 }
  0x42   : > { %2778 = vmatprep.subr.bf16.mxu0 %v2777_v54  ;;  %2896 = vmatpush3.bf16.msra.mxu1 %v2895_v5  ;;  %v956_v30 = vld [vmem:[#allocation4 + $0x280] sm:$0xff]  ;;  %v2789_v36 = vpack.c.bf16 %v928_v27, %v925_v26  ;;  %v927_v37 = vld [vmem:[#allocation4 + $0x198] sm:$0xff]  ;;  %v3325_v40 = vld [vmem:[%s3277_s25 + $0x48] sm:$0xff] }
  0x43   : > { %2898 = vmatprep.subr.bf16.mxu1 %v2897_v14  ;;  %v924_v34 = vld [vmem:[#allocation4 + $0x180] sm:$0xff]  ;;  %v911_v39 = vld [vmem:[#allocation4 + $0x118] sm:$0xff]  ;;  %v934_v42 = vld [vmem:[#allocation4 + $0x1d0] sm:$0xff]  ;;  %v2905_v43 = vpack.c.bf16 %v959_v31, %v956_v30 }
  0x44   : > { %329 = vperm.xlu0 %3040, %v3300_v29   ;;  %v908_v38 = vld [vmem:[#allocation4 + $0x100] sm:$0xff]  ;;  %v931_v41 = vld [vmem:[#allocation4 + $0x1b8] sm:$0xff]  ;;  %v962_v44 = vld [vmem:[#allocation4 + $0x2b0] sm:$0xff]  ;;  %v2791_v46 = vpack.c.bf16 %v927_v37, %v924_v34 }
  0x45   : > { %457 = vperm.xlu1 %3043, %v3300_v29   ;;  %2780 = vmatpush1.bf16.msra.mxu0 %v2779_v0  ;;  %v965_v45 = vld [vmem:[#allocation4 + $0x2c8] sm:$0xff]  ;;  %v930_v47 = vld [vmem:[#allocation4 + $0x1b0] sm:$0xff]  ;;  %v2907_v48 = vpack.c.bf16 %v911_v39, %v908_v38  ;;  %v2793_v50 = vpack.c.bf16 %v934_v42, %v931_v41  ;;  %v940_v56 = vld [vmem:[#allocation4 + $0x200] sm:$0xff] }
  0x46   : > { %2782 = vmatprep.subr.bf16.mxu0 %v2781_v7  ;;  %2900 = vmatpush3.bf16.msra.mxu1 %v2899_v19  ;;  %v933_v51 = vld [vmem:[#allocation4 + $0x1c8] sm:$0xff]  ;;  %v914_v52 = vld [vmem:[#allocation4 + $0x130] sm:$0xff]  ;;  %v2909_v57 = vpack.c.bf16 %v965_v45, %v962_v44  ;;  %v968_v58 = vld [vmem:[#allocation4 + $0x2e0] sm:$0xff] }
  0x47   : > { %2902 = vmatprep.subr.bf16.mxu1 %v2901_v28  ;;  %v917_v53 = vld [vmem:[#allocation4 + $0x148] sm:$0xff]  ;;  %v3330_v54 = vld [vmem:[%s3277_s25 + $0x50] sm:$0xff]  ;;  %v971_v59 = vld [vmem:[#allocation4 + $0x2f8] sm:$0xff]  ;;  %v2795_v60 = vpack.c.bf16 %v933_v51, %v930_v47 }
  0x48   : > { %332 = vperm.xlu0 %3040, %v3303_v33   ;;  %v937_v55 = vld [vmem:[#allocation4 + $0x1e8] sm:$0xff]  ;;  %v936_v61 = vld [vmem:[#allocation4 + $0x1e0] sm:$0xff]  ;;  %v2911_v62 = vpack.c.bf16 %v917_v53, %v914_v52  ;;  %v939_v0 = vld [vmem:[#allocation4 + $0x1f8] sm:$0xff]  ;;  %v2913_v9 = vpack.c.bf16 %v971_v59, %v968_v58  ;;  %v3174_v59 = vmov 2  }
  0x49   : > { %460 = vperm.xlu1 %3043, %v3303_v33   ;;  %2784 = vmatpush1.bf16.msra.mxu0 %v2783_v17  ;;  %v2797_v63 = vpack.c.bf16 %v940_v56, %v937_v55  ;;  %v920_v3 = vld [vmem:[#allocation4 + $0x160] sm:$0xff]  ;;  %v923_v5 = vld [vmem:[#allocation4 + $0x178] sm:$0xff]  ;;  %v946_v8 = vld [vmem:[#allocation4 + $0x230] sm:$0xff]  ;;  %v2799_v10 = vpack.c.bf16 %v939_v0, %v936_v61 }
  0x4a   : > { %2786 = vmatprep.subr.bf16.mxu0 %v2785_v20  ;;  %2904 = vmatpush3.bf16.msra.mxu1 %v2903_v35  ;;  %v3335_v6 = vld [vmem:[%s3277_s25 + $0x58] sm:$0xff]  ;;  %v2915_v12 = vpack.c.bf16 %v923_v5, %v920_v3  ;;  %v942_v14 = vld [vmem:[#allocation4 + $0x210] sm:$0xff]  ;;  %v945_v15 = vld [vmem:[#allocation4 + $0x228] sm:$0xff] }
  0x4b   : > { %2906 = vmatprep.subr.bf16.mxu1 %v2905_v43  ;;  %v943_v7 = vld [vmem:[#allocation4 + $0x218] sm:$0xff]  ;;  %v3340_v16 = vld [vmem:[%s3277_s25 + $0x60] sm:$0xff]  ;;  %v949_v17 = vld [vmem:[#allocation4 + $0x248] sm:$0xff]  ;;  %v2803_v20 = vpack.c.bf16 %v945_v15, %v942_v14 }
  0x4c   : > { %335 = vperm.xlu0 %3040, %v3308_v49   ;;  %v2801_v13 = vpack.c.bf16 %v946_v8, %v943_v7  ;;  %v952_v18 = vld [vmem:[#allocation4 + $0x260] sm:$0xff]  ;;  %v1022_v19 = vld [vmem:[#allocation4 + $0x490] sm:$0xff]  ;;  %v1025_v21 = vld [vmem:[#allocation4 + $0x4a8] sm:$0xff] }
  0x4d   : > { %463 = vperm.xlu1 %3043, %v3308_v49   ;;  %2788 = vmatpush1.bf16.msra.mxu0 %v2787_v32  ;;  %v2805_v23 = vpack.c.bf16 %v952_v18, %v949_v17  ;;  %v948_v24 = vld [vmem:[#allocation4 + $0x240] sm:$0xff]  ;;  %v951_v26 = vld [vmem:[#allocation4 + $0x258] sm:$0xff]  ;;  %v2917_v27 = vpack.c.bf16 %v1025_v21, %v1022_v19  ;;  %v3345_v28 = vld [vmem:[%s3277_s25 + $0x68] sm:$0xff] }
  0x4e   : > { %2790 = vmatprep.subr.bf16.mxu0 %v2789_v36  ;;  %2908 = vmatpush3.bf16.msra.mxu1 %v2907_v48  ;;  %v955_v30 = vld [vmem:[#allocation4 + $0x278] sm:$0xff]  ;;  %v958_v31 = vld [vmem:[#allocation4 + $0x290] sm:$0xff]  ;;  %v2807_v32 = vpack.c.bf16 %v951_v26, %v948_v24  ;;  %v957_v36 = vld [vmem:[#allocation4 + $0x288] sm:$0xff] }
  0x4f   : > { %2910 = vmatprep.subr.bf16.mxu1 %v2909_v57  ;;  %v2809_v34 = vpack.c.bf16 %v958_v31, %v955_v30  ;;  %v954_v35 = vld [vmem:[#allocation4 + $0x270] sm:$0xff]  ;;  %v961_v38 = vld [vmem:[#allocation4 + $0x2a8] sm:$0xff]  ;;  %v964_v39 = vld [vmem:[#allocation4 + $0x2c0] sm:$0xff]  ;;  %v3173_v57 = vmov 3  }
  0x50   : > { %338 = vperm.xlu0 %3040, %v3315_v11   ;;  %v3350_v37 = vld [vmem:[%s3277_s25 + $0x70] sm:$0xff]  ;;  %v2811_v41 = vpack.c.bf16 %v957_v36, %v954_v35  ;;  %v2813_v42 = vpack.c.bf16 %v964_v39, %v961_v38  ;;  %v960_v43 = vld [vmem:[#allocation4 + $0x2a0] sm:$0xff]  ;;  %v963_v44 = vld [vmem:[#allocation4 + $0x2b8] sm:$0xff] }
  0x51   : > { %466 = vperm.xlu1 %3043, %v3315_v11   ;;  %2792 = vmatpush1.bf16.msra.mxu0 %v2791_v46  ;;  %v3355_v45 = vld [vmem:[%s3277_s25 + $0x78] sm:$0xff]  ;;  %v970_v47 = vld [vmem:[#allocation4 + $0x2f0] sm:$0xff]  ;;  %v2815_v48 = vpack.c.bf16 %v963_v44, %v960_v43  ;;  %v969_v52 = vld [vmem:[#allocation4 + $0x2e8] sm:$0xff]  ;;  %s3863_s25 = scalar_lea.vmem %s3929_s7, %s2293_s22 }
  0x52   : > { %2794 = vmatprep.subr.bf16.mxu0 %v2793_v50  ;;  %2912 = vmatpush3.bf16.msra.mxu1 %v2911_v62  ;;  %v967_v46 = vld [vmem:[#allocation4 + $0x2d8] sm:$0xff]  ;;  %v966_v51 = vld [vmem:[#allocation4 + $0x2d0] sm:$0xff]  ;;  %v973_v53 = vld [vmem:[#allocation4 + $0x308] sm:$0xff] }
  0x53   : > { %2914 = vmatprep.subr.bf16.mxu1 %v2913_v9  ;;  %v2817_v50 = vpack.c.bf16 %v970_v47, %v967_v46  ;;  %v976_v55 = vld [vmem:[#allocation4 + $0x320] sm:$0xff]  ;;  %v2819_v56 = vpack.c.bf16 %v969_v52, %v966_v51  ;;  %v978_v3 = vld [vmem:[#allocation4 + $0x330] sm:$0xff]  ;;  %v1031_v8 = vld [vmem:[#allocation4 + $0x4d8] sm:$0xff] }
  0x54   : > { %341 = vperm.xlu0 %3040, %v3320_v25   ;;  %v2821_v58 = vpack.c.bf16 %v976_v55, %v973_v53  ;;  %v1028_v7 = vld [vmem:[#allocation4 + $0x4c0] sm:$0xff]  ;;  %v985_v9 = vld [vmem:[#allocation4 + $0x368] sm:$0xff]  ;;  %v987_v18 = vld [vmem:[#allocation4 + $0x378] sm:$0xff] }
  0x55   : > { %469 = vperm.xlu1 %3043, %v3320_v25   ;;  %2796 = vmatpush1.bf16.msra.mxu0 %v2795_v60  ;;  %v977_v60 = vld [vmem:[#allocation4 + $0x328] sm:$0xff]  ;;  %v984_v14 = vld [vmem:[#allocation4 + $0x360] sm:$0xff]  ;;  %v2921_v15 = vpack.c.bf16 %v1031_v8, %v1028_v7  ;;  %v991_v21 = vld [vmem:[#allocation4 + $0x398] sm:$0xff] }
  0x56   : > { %2798 = vmatprep.subr.bf16.mxu0 %v2797_v63  ;;  %2916 = vmatpush3.bf16.msra.mxu1 %v2915_v12  ;;  %v980_v19 = vld [vmem:[#allocation4 + $0x340] sm:$0xff]  ;;  %v990_v31 = vld [vmem:[#allocation4 + $0x390] sm:$0xff]  ;;  %v999_v46 = vld [vmem:[#allocation4 + $0x3d8] sm:$0xff] }
  0x57   : > { %2918 = vmatprep.subr.bf16.mxu1 %v2917_v27  ;;  %v2831_v27 = vpack.c.bf16 %v987_v18, %v984_v14  ;;  %v1000_v35 = vld [vmem:[#allocation4 + $0x3e0] sm:$0xff]  ;;  %v1003_v47 = vld [vmem:[#allocation4 + $0x3f8] sm:$0xff]  ;;  %v986_v55 = vld [vmem:[#allocation4 + $0x370] sm:$0xff] }
  0x58   : > { %344 = vperm.xlu0 %3040, %v3325_v40   ;;  %v996_v44 = vld [vmem:[#allocation4 + $0x3c0] sm:$0xff] }
  0x59   : > { %472 = vperm.xlu1 %3043, %v3325_v40   ;;  %2800 = vmatpush1.bf16.msra.mxu0 %v2799_v10  ;;  %v988_v10 = vld [vmem:[#allocation4 + $0x380] sm:$0xff]  ;;  %v2839_v53 = vpack.c.bf16 %v999_v46, %v996_v44  ;;  %v1029_v44 = vld [vmem:[#allocation4 + $0x4c8] sm:$0xff]  ;;  %v1058_v46 = vld [vmem:[#allocation4 + $0x5b0] sm:$0xff] }
  0x5a   : > { %2802 = vmatprep.subr.bf16.mxu0 %v2801_v13  ;;  %v2829_v17 = vpack.c.bf16 %v988_v10, %v985_v9  ;;  %v992_v8 = vld [vmem:[#allocation4 + $0x3a0] sm:$0xff]  ;;  %v995_v9 = vld [vmem:[#allocation4 + $0x3b8] sm:$0xff] }
  0x5c   : > { %347 = vperm.xlu0 %3040, %v3330_v54  }
  0x5d   : > { %475 = vperm.xlu1 %3043, %v3330_v54   ;;  %2804 = vmatpush1.bf16.msra.mxu0 %v2803_v20  ;;  %v983_v20 = vld [vmem:[#allocation4 + $0x358] sm:$0xff] }
  0x5e   : > { %2806 = vmatprep.subr.bf16.mxu0 %v2805_v23  ;;  %v994_v23 = vld [vmem:[#allocation4 + $0x3b0] sm:$0xff]  ;;  %v2923_v30 = vpack.c.bf16 %v983_v20, %v980_v19  ;;  %v1020_v19 = vld [vmem:[#allocation4 + $0x480] sm:$0xff] }
  0x60   : > { %350 = vperm.xlu0 %3040, %v3335_v6  }
  0x61   : > { %478 = vperm.xlu1 %3043, %v3335_v6   ;;  %2808 = vmatpush1.bf16.msra.mxu0 %v2807_v32  ;;  %v993_v32 = vld [vmem:[#allocation4 + $0x3a8] sm:$0xff] }
  0x62   : > { %2810 = vmatprep.subr.bf16.mxu0 %v2809_v34  ;;  %v997_v34 = vld [vmem:[#allocation4 + $0x3c8] sm:$0xff]  ;;  %v2835_v39 = vpack.c.bf16 %v993_v32, %v990_v31  ;;  %v1030_v31 = vld [vmem:[#allocation4 + $0x4d0] sm:$0xff] }
  0x63   : > { %v2837_v43 = vpack.c.bf16 %v1000_v35, %v997_v34 }
  0x64   : > { %353 = vperm.xlu0 %3040, %v3340_v16  }
  0x65   : > { %481 = vperm.xlu1 %3043, %v3340_v16   ;;  %2812 = vmatpush1.bf16.msra.mxu0 %v2811_v41  ;;  %v1034_v41 = vld [vmem:[#allocation4 + $0x4f0] sm:$0xff] }
  0x66   : > { %2814 = vmatprep.subr.bf16.mxu0 %v2813_v42  ;;  %v1037_v42 = vld [vmem:[#allocation4 + $0x508] sm:$0xff] }
  0x67   : > { %v2925_v51 = vpack.c.bf16 %v1037_v42, %v1034_v41  ;;  %v1004_v41 = vld [vmem:[#allocation4 + $0x400] sm:$0xff]  ;;  %v1007_v42 = vld [vmem:[#allocation4 + $0x418] sm:$0xff] }
  0x68   : > { %356 = vperm.xlu0 %3040, %v3345_v28  }
  0x69   : > { %484 = vperm.xlu1 %3043, %v3345_v28   ;;  %2816 = vmatpush1.bf16.msra.mxu0 %v2815_v48  ;;  %v1006_v48 = vld [vmem:[#allocation4 + $0x410] sm:$0xff] }
  0x6a   : > { %2818 = vmatprep.subr.bf16.mxu0 %v2817_v50 }
  0x6c   : > { %359 = vperm.xlu0 %3040, %v3350_v37  }
  0x6d   : > { %487 = vperm.xlu1 %3043, %v3350_v37   ;;  %2820 = vmatpush1.bf16.msra.mxu0 %v2819_v56  ;;  %v989_v56 = vld [vmem:[#allocation4 + $0x388] sm:$0xff] }
  0x6e   : > { %2822 = vmatprep.subr.bf16.mxu0 %v2821_v58  ;;  %v2841_v58 = vpack.c.bf16 %v1006_v48, %v1003_v47  ;;  %v1061_v47 = vld [vmem:[#allocation4 + $0x5c8] sm:$0xff] }
  0x6f   : > { %v1033_v48 = vld [vmem:[#allocation4 + $0x4e8] sm:$0xff] }
  0x70   : > { %362 = vperm.xlu0 %3040, %v3355_v45  }
  0x71   : > { %490 = vperm.xlu1 %3043, %v3355_v45  }
  0x74   : > { %3046 = vset.pattern.permute.xlu0 %v3173_v57 }
  0x75   : > { %3044 = vset.pattern.permute.xlu1 %v3173_v57  ;;  %707 = vperm.xlu0 %3046, %v3288_v4  }
  0x76   : > { %701 = vperm.xlu1 %3044, %v3283_v2  }
  0x79   : > { %3047 = vset.pattern.permute.xlu0 %v3174_v59 }
  0x7a   : > { %704 = vperm.xlu1 %3044, %v3280_v1   ;;  %573 = vperm.xlu0 %3047, %v3283_v2  }
  0x7e   : > { %3045 = vset.pattern.permute.xlu1 %v3174_v59  ;;  %582 = vperm.xlu0 %3047, %v3295_v22  }
  0x7f   : > { %576 = vperm.xlu1 %3045, %v3280_v1   ;;  %v298_v1 = vlaneseq }
  0x81   : > { %v3400_v2 = vand.u32 127, %v298_v1  ;;  %v1005_v1 = vld [vmem:[#allocation4 + $0x408] sm:$0xff] }
  0x82   : > { %3050 = vset.pattern.permute.xlu0 %v3173_v57 }
  0x83   : > { %579 = vperm.xlu1 %3045, %v3288_v4   ;;  %716 = vperm.xlu0 %3050, %v3303_v33  }
  0x87   : > { %3048 = vset.pattern.permute.xlu1 %v3173_v57  ;;  %725 = vperm.xlu0 %3050, %v3320_v25  }
  0x88   : > { %710 = vperm.xlu1 %3048, %v3295_v22  }
  0x8b   : > { %3053 = vset.pattern.permute.xlu0 %v3174_v59 }
  0x8c   : > { %713 = vperm.xlu1 %3048, %v3300_v29   ;;  %591 = vperm.xlu0 %3053, %v3308_v49  }
  0x90   : > { %3049 = vset.pattern.permute.xlu1 %v3174_v59  ;;  %600 = vperm.xlu0 %3053, %v3325_v40  }
  0x91   : > { %585 = vperm.xlu1 %3049, %v3300_v29   ;;  %v3175_v29 = vmov 1.0  }
  0x94   : > { %3056 = vset.pattern.permute.xlu0 %v3173_v57 }
  0x95   : > { %588 = vperm.xlu1 %3049, %v3303_v33   ;;  %734 = vperm.xlu0 %3056, %v3335_v6   ;;  %v972_v33 = vld [vmem:[#allocation4 + $0x300] sm:$0xff] }
  0x99   : > { %3051 = vset.pattern.permute.xlu1 %v3173_v57  ;;  %3058 = vset.pattern.permute.xlu0 %v3174_v59 }
  0x9a   : > { %719 = vperm.xlu1 %3051, %v3308_v49   ;;  %609 = vperm.xlu0 %3058, %v3340_v16   ;;  %v975_v49 = vld [vmem:[#allocation4 + $0x318] sm:$0xff] }
  0x9b   : > { %v2823_v63 = vpack.c.bf16 %v975_v49, %v972_v33  ;;  %v1009_v49 = vld [vmem:[#allocation4 + $0x428] sm:$0xff] }
  0x9e   : > { %722 = vperm.xlu1 %3051, %v3315_v11   ;;  %3060 = vset.pattern.permute.xlu0 %v3173_v57 }
  0x9f   : > { %743 = vperm.xlu0 %3060, %v3350_v37  }
  0xa2   : > { %3052 = vset.pattern.permute.xlu1 %v3174_v59 }
  0xa3   : > { %594 = vperm.xlu1 %3052, %v3315_v11   ;;  %3062 = vset.pattern.permute.xlu0 %v3174_v59  ;;  %v979_v11 = vld [vmem:[#allocation4 + $0x338] sm:$0xff] }
  0xa4   : > { %618 = vperm.xlu0 %3062, %v3355_v45  }
  0xa7   : > { %597 = vperm.xlu1 %3052, %v3320_v25   ;;  %v982_v25 = vld [vmem:[#allocation4 + $0x350] sm:$0xff] }
  0xa8   : > { %3063 = vset.pattern.permute.xlu0 %v3173_v57  ;;  %v2825_v0 = vpack.c.bf16 %v982_v25, %v979_v11  ;;  %v1012_v11 = vld [vmem:[#allocation4 + $0x440] sm:$0xff] }
  0xa9   : > { %v1008_v25 = vld [vmem:[#allocation4 + $0x420] sm:$0xff] }
  0xab   : > { %3054 = vset.pattern.permute.xlu1 %v3173_v57 }
  0xac   : > { %728 = vperm.xlu1 %3054, %v3325_v40   ;;  %v974_v40 = vld [vmem:[#allocation4 + $0x310] sm:$0xff] }
  0xad   : > { %v2919_v5 = vpack.c.bf16 %v977_v60, %v974_v40  ;;  %v1011_v40 = vld [vmem:[#allocation4 + $0x438] sm:$0xff]  ;;  %v1040_v60 = vld [vmem:[#allocation4 + $0x520] sm:$0xff] }
  0xb0   : > { %731 = vperm.xlu1 %3054, %v3330_v54  }
  0xb2   : > { %v449_v4 = vpop.permute.xlu1 %448  ;;  %v446_v22 = vpop.permute.xlu0 %445 }
  0xb3   : > { %vm492_vm0 = vcmp.eq.s32.totalorder %v3400_v2, %v446_v22  ;;  %vm493_vm2 = vcmp.eq.s32.totalorder %v3400_v2, %v449_v4  ;;  %v2927_v4 = vpack.c.bf16 %v989_v56, %v986_v55  ;;  %v1032_v56 = vld [vmem:[#allocation4 + $0x4e0] sm:$0xff] }
  0xb4   : > { %3055 = vset.pattern.permute.xlu1 %v3174_v59  ;;  %2381 = vmatprep.mubr.msk.f32.mxu0 %vm492_vm0, %v3175_v29 }
  0xb5   : > { %603 = vperm.xlu1 %3055, %v3330_v54   ;;  %2445 = vmatprep.mubr.msk.f32.mxu1 %vm492_vm0, %v3175_v29  ;;  %v981_v54 = vld [vmem:[#allocation4 + $0x348] sm:$0xff] }
  0xb7   : > { %v321_v61 = vpop.permute.xlu1 %320  ;;  %v318_v62 = vpop.permute.xlu0 %317 }
  0xb8   : > { %vm364_vm1 = vcmp.eq.s32.totalorder %v3400_v2, %v318_v62  ;;  %vm365_vm3 = vcmp.eq.s32.totalorder %v3400_v2, %v321_v61  ;;  %v1043_v61 = vld [vmem:[#allocation4 + $0x538] sm:$0xff]  ;;  %v1018_v62 = vld [vmem:[#allocation4 + $0x470] sm:$0xff] }
  0xb9   : > { %606 = vperm.xlu1 %3055, %v3335_v6   ;;  %2382 = vmatmul.mubr.msk.f32.vlgmr.msra.gmra.mrb[0].mxu0 %vm364_vm1, %v3175_v29  ;;  %v2827_v6 = vpack.c.bf16 %v981_v54, %v978_v3  ;;  %v1014_v54 = vld [vmem:[#allocation4 + $0x450] sm:$0xff]  ;;  %v2929_v7 = vpack.c.bf16 %v1043_v61, %v1040_v60 }
  0xba   : > { %2446 = vmatmul.mubr.msk.f32.vlgmr.msra.gmra.mrb[0].mxu1 %vm364_vm1, %v3175_v29  ;;  %2383 = vmatprep.mubr.msk.f32.mxu0 %vm493_vm2, %v3175_v29 }
  0xbb   : > { %2447 = vmatprep.mubr.msk.f32.mxu1 %vm493_vm2, %v3175_v29  ;;  %v324_v12 = vpop.permute.xlu0 %323  ;;  %2824 = vmatpush1.bf16.msra.mxu0 %v2823_v63 }
  0xbc   : > { %v452_v13 = vpop.permute.xlu1 %451  ;;  %2826 = vmatprep.subr.bf16.mxu0 %v2825_v0  ;;  %2920 = vmatpush3.bf16.msra.mxu1 %v2919_v5  ;;  %vm366_vm5 = vcmp.eq.s32.totalorder %v3400_v2, %v324_v12  ;;  %v2845_v0 = vpack.c.bf16 %v1012_v11, %v1009_v49  ;;  %v2847_v5 = vpack.c.bf16 %v1011_v40, %v1008_v25  ;;  %v1017_v12 = vld [vmem:[#allocation4 + $0x468] sm:$0xff]  ;;  %v1039_v49 = vld [vmem:[#allocation4 + $0x518] sm:$0xff]  ;;  %v1042_v11 = vld [vmem:[#allocation4 + $0x530] sm:$0xff] }
  0xbd   : > { %vm494_vm4 = vcmp.eq.s32.totalorder %v3400_v2, %v452_v13  ;;  %3057 = vset.pattern.permute.xlu1 %v3173_v57  ;;  %2384 = vmatmul.mubr.msk.f32.gmra.mrb[2].mxu0 %vm365_vm3, %v3175_v29  ;;  %v1046_v13 = vld [vmem:[#allocation4 + $0x550] sm:$0xff]  ;;  %v2851_v18 = vpack.c.bf16 %v1017_v12, %v1014_v54  ;;  %v1045_v54 = vld [vmem:[#allocation4 + $0x548] sm:$0xff] }
  0xbe   : > { %2448 = vmatmul.mubr.msk.f32.gmra.mrb[2].mxu1 %vm365_vm3, %v3175_v29  ;;  %737 = vperm.xlu1 %3057, %v3340_v16   ;;  %v2833_v16 = vpack.c.bf16 %v994_v23, %v991_v21  ;;  %v998_v21 = vld [vmem:[#allocation4 + $0x3d0] sm:$0xff]  ;;  %v1001_v23 = vld [vmem:[#allocation4 + $0x3e8] sm:$0xff] }
  0xbf   : > { %2385 = vmatprep.mubr.msk.f32.mxu0 %vm494_vm4, %v3175_v29  ;;  %2449 = vmatprep.mubr.msk.f32.mxu1 %vm494_vm4, %v3175_v29  ;;  %v327_v24 = vpop.permute.xlu0 %326  ;;  %v2935_v34 = vpack.c.bf16 %v1001_v23, %v998_v21  ;;  %v1053_v21 = vld [vmem:[#allocation4 + $0x588] sm:$0xff] }
  0xc0   : > { %v455_v26 = vpop.permute.xlu1 %454  ;;  %2828 = vmatpush1.bf16.msra.mxu0 %v2827_v6  ;;  %2922 = vmatprep.subr.bf16.mxu1 %v2921_v15  ;;  %vm367_vm7 = vcmp.eq.s32.totalorder %v3400_v2, %v327_v24  ;;  %v1049_v6 = vld [vmem:[#allocation4 + $0x568] sm:$0xff]  ;;  %v2931_v15 = vpack.c.bf16 %v995_v9, %v992_v8 }
  0xc1   : > { %vm495_vm6 = vcmp.eq.s32.totalorder %v3400_v2, %v455_v26  ;;  %2386 = vmatmul.mubr.msk.f32.gmra.mrb[4].mxu0 %vm366_vm5, %v3175_v29  ;;  %2830 = vmatprep.subr.bf16.mxu0 %v2829_v17  ;;  %v2933_v20 = vpack.c.bf16 %v1049_v6, %v1046_v13  ;;  %v1023_v26 = vld [vmem:[#allocation4 + $0x498] sm:$0xff]  ;;  %v1044_v6 = vld [vmem:[#allocation4 + $0x540] sm:$0xff]  ;;  %v1057_v23 = vld [vmem:[#allocation4 + $0x5a8] sm:$0xff] }
  0xc2   : > { %2450 = vmatmul.mubr.msk.f32.gmra.mrb[4].mxu1 %vm366_vm5, %v3175_v29  ;;  %740 = vperm.xlu1 %3057, %v3345_v28  }
  0xc3   : > { %2387 = vmatprep.mubr.msk.f32.mxu0 %vm495_vm6, %v3175_v29  ;;  %2451 = vmatprep.mubr.msk.f32.mxu1 %vm495_vm6, %v3175_v29  ;;  %v330_v36 = vpop.permute.xlu0 %329 }
  0xc4   : > { %v458_v38 = vpop.permute.xlu1 %457  ;;  %2832 = vmatpush1.bf16.msra.mxu0 %v2831_v27  ;;  %2924 = vmatpush3.bf16.msra.mxu1 %v2923_v30  ;;  %vm368_vm9 = vcmp.eq.s32.totalorder %v3400_v2, %v330_v36  ;;  %v1052_v27 = vld [vmem:[#allocation4 + $0x580] sm:$0xff]  ;;  %v1055_v30 = vld [vmem:[#allocation4 + $0x598] sm:$0xff]  ;;  %v2855_v36 = vpack.c.bf16 %v1023_v26, %v1020_v19 }
  0xc5   : > { %vm496_vm8 = vcmp.eq.s32.totalorder %v3400_v2, %v458_v38  ;;  %2388 = vmatmul.mubr.msk.f32.gmra.mrb[6].mxu0 %vm367_vm7, %v3175_v29  ;;  %2834 = vmatprep.subr.bf16.mxu0 %v2833_v16  ;;  %v1027_v16 = vld [vmem:[#allocation4 + $0x4b8] sm:$0xff]  ;;  %v1026_v38 = vld [vmem:[#allocation4 + $0x4b0] sm:$0xff] }
  0xc6   : > { %2452 = vmatmul.mubr.msk.f32.gmra.mrb[6].mxu1 %vm367_vm7, %v3175_v29  ;;  %3059 = vset.pattern.permute.xlu1 %v3174_v59  ;;  %v1002_v59 = vld [vmem:[#allocation4 + $0x3f0] sm:$0xff]  ;;  %v2859_v55 = vpack.c.bf16 %v1029_v44, %v1026_v38 }
  0xc7   : > { %2389 = vmatprep.mubr.msk.f32.mxu0 %vm496_vm8, %v3175_v29  ;;  %2453 = vmatprep.mubr.msk.f32.mxu1 %vm496_vm8, %v3175_v29  ;;  %v333_v50 = vpop.permute.xlu0 %332  ;;  %v2843_v33 = vpack.c.bf16 %v1005_v1, %v1002_v59  ;;  %v1010_v59 = vld [vmem:[#allocation4 + $0x430] sm:$0xff]  ;;  %v1013_v1 = vld [vmem:[#allocation4 + $0x448] sm:$0xff] }
  0xc8   : > { %612 = vperm.xlu1 %3059, %v3345_v28   ;;  %v461_v52 = vpop.permute.xlu1 %460  ;;  %2836 = vmatpush1.bf16.msra.mxu0 %v2835_v39  ;;  %vm369_vm11 = vcmp.eq.s32.totalorder %v3400_v2, %v333_v50  ;;  %v2937_v39 = vpack.c.bf16 %v1055_v30, %v1052_v27  ;;  %v1036_v50 = vld [vmem:[#allocation4 + $0x500] sm:$0xff]  ;;  %v2943_v40 = vpack.c.bf16 %v1013_v1, %v1010_v59 }
  0xc9   : > { %vm497_vm10 = vcmp.eq.s32.totalorder %v3400_v2, %v461_v52  ;;  %2390 = vmatmul.mubr.msk.f32.gmra.mrb[8].mxu0 %vm368_vm9, %v3175_v29  ;;  %2838 = vmatprep.subr.bf16.mxu0 %v2837_v43  ;;  %v2857_v43 = vpack.c.bf16 %v1030_v31, %v1027_v16  ;;  %v2939_v52 = vpack.c.bf16 %v1007_v42, %v1004_v41  ;;  %v1056_v31 = vld [vmem:[#allocation4 + $0x5a0] sm:$0xff]  ;;  %v1062_v42 = vld [vmem:[#allocation4 + $0x5d0] sm:$0xff] }
  0xca   : > { %2454 = vmatmul.mubr.msk.f32.gmra.mrb[8].mxu1 %vm368_vm9, %v3175_v29  ;;  %2391 = vmatprep.mubr.msk.f32.mxu0 %vm497_vm10, %v3175_v29 }
  0xcb   : > { %2455 = vmatprep.mubr.msk.f32.mxu1 %vm497_vm10, %v3175_v29  ;;  %v336_v28 = vpop.permute.xlu0 %335  ;;  %2926 = vmatprep.subr.bf16.mxu1 %v2925_v51 }
  0xcc   : > { %615 = vperm.xlu1 %3059, %v3350_v37   ;;  %v464_v22 = vpop.permute.xlu1 %463  ;;  %2840 = vmatpush1.bf16.msra.mxu0 %v2839_v53  ;;  %vm370_vm13 = vcmp.eq.s32.totalorder %v3400_v2, %v336_v28  ;;  %v1015_v37 = vld [vmem:[#allocation4 + $0x458] sm:$0xff]  ;;  %v2861_v28 = vpack.c.bf16 %v1036_v50, %v1033_v48 }
  0xcd   : > { %vm498_vm12 = vcmp.eq.s32.totalorder %v3400_v2, %v464_v22  ;;  %2392 = vmatmul.mubr.msk.f32.gmra.mrb[10].mxu0 %vm369_vm11, %v3175_v29  ;;  %2842 = vmatprep.subr.bf16.mxu0 %v2841_v58  ;;  %v2849_v10 = vpack.c.bf16 %v1018_v62, %v1015_v37  ;;  %v2941_v58 = vpack.c.bf16 %v1061_v47, %v1058_v46  ;;  %v1064_v22 = vld [vmem:[#allocation4 + $0x5e0] sm:$0xff] }
  0xce   : > { %2456 = vmatmul.mubr.msk.f32.gmra.mrb[10].mxu1 %vm369_vm11, %v3175_v29  ;;  %2393 = vmatprep.mubr.msk.f32.mxu0 %vm498_vm12, %v3175_v29  ;;  %v1016_v62 = vld [vmem:[#allocation4 + $0x460] sm:$0xff] }
  0xcf   : > { %2457 = vmatprep.mubr.msk.f32.mxu1 %vm498_vm12, %v3175_v29  ;;  %v339_v63 = vpop.permute.xlu0 %338  ;;  %2928 = vmatpush3.bf16.msra.mxu1 %v2927_v4  ;;  %v1035_v4 = vld [vmem:[#allocation4 + $0x4f8] sm:$0xff] }
  0xd0   : > { %3061 = vset.pattern.permute.xlu1 %v3173_v57  ;;  %v467_v3 = vpop.permute.xlu1 %466  ;;  %2844 = vmatpush1.bf16.msra.mxu0 %v2843_v33  ;;  %vm371_vm15 = vcmp.eq.s32.totalorder %v3400_v2, %v339_v63  ;;  %v1021_v57 = vld [vmem:[#allocation4 + $0x488] sm:$0xff]  ;;  %v1067_v33 = vld [vmem:[#allocation4 + $0x5f8] sm:$0xff]  ;;  %v2863_v61 = vpack.c.bf16 %v1035_v4, %v1032_v56 }
  0xd1   : > { %746 = vperm.xlu1 %3061, %v3355_v45   ;;  %vm499_vm14 = vcmp.eq.s32.totalorder %v3400_v2, %v467_v3  ;;  %2394 = vmatmul.mubr.msk.f32.gmra.mrb[12].mxu0 %vm370_vm13, %v3175_v29  ;;  %v1024_v45 = vld [vmem:[#allocation4 + $0x4a0] sm:$0xff]  ;;  %v2945_v37 = vpack.c.bf16 %v1067_v33, %v1064_v22  ;;  %v1019_v63 = vld [vmem:[#allocation4 + $0x478] sm:$0xff]  ;;  %v1038_v3 = vld [vmem:[#allocation4 + $0x510] sm:$0xff] }
  0xd2   : > { %2458 = vmatmul.mubr.msk.f32.gmra.mrb[12].mxu1 %vm370_vm13, %v3175_v29  ;;  %2395 = vmatprep.mubr.msk.f32.mxu0 %vm499_vm14, %v3175_v29  ;;  %v2853_v24 = vpack.c.bf16 %v1024_v45, %v1021_v57  ;;  %v2947_v9 = vpack.c.bf16 %v1019_v63, %v1016_v62  ;;  %v1047_v57 = vld [vmem:[#allocation4 + $0x558] sm:$0xff]  ;;  %v1719_v62 = vld [vmem:[%s3925_s3] sm:$0xff]  ;;  %v1720_v63 = vld [vmem:[%s3925_s3 + $0x8] sm:$0xff] }
  0xd3   : > { %2459 = vmatprep.mubr.msk.f32.mxu1 %vm499_vm14, %v3175_v29  ;;  %2846 = vmatprep.subr.bf16.mxu0 %v2845_v0  ;;  %v342_v14 = vpop.permute.xlu0 %341  ;;  %v2865_v0 = vpack.c.bf16 %v1042_v11, %v1039_v49  ;;  %v1051_v45 = vld [vmem:[#allocation4 + $0x578] sm:$0xff] }
  0xd4   : > { %v470_v17 = vpop.permute.xlu1 %469  ;;  %2848 = vmatpush1.bf16.msra.mxu0 %v2847_v5  ;;  %2930 = vmatprep.subr.bf16.mxu1 %v2929_v7  ;;  %vm372_vm1 = vcmp.eq.s32.totalorder %v3400_v2, %v342_v14  ;;  %v1041_v5 = vld [vmem:[#allocation4 + $0x528] sm:$0xff]  ;;  %v1048_v7 = vld [vmem:[#allocation4 + $0x560] sm:$0xff]  ;;  %v1054_v14 = vld [vmem:[#allocation4 + $0x590] sm:$0xff] }
  0xd5   : > { %vm500_vm0 = vcmp.eq.s32.totalorder %v3400_v2, %v470_v17  ;;  %2396 = vmatmul.mubr.msk.f32.gmra.mrb[14].mxu0 %vm371_vm15, %v3175_v29  ;;  %2850 = vmatprep.subr.bf16.mxu0 %v2849_v10  ;;  %v2867_v12 = vpack.c.bf16 %v1041_v5, %v1038_v3  ;;  %v2869_v13 = vpack.c.bf16 %v1048_v7, %v1045_v54  ;;  %v1721_v54 = vld [vmem:[%s3925_s3 + $0x10] sm:$0xff]  ;;  %v1722_v7 = vld [vmem:[%s3925_s3 + $0x18] sm:$0xff] }
  0xd6   : > { %2460 = vmatmul.mubr.msk.f32.gmra.mrb[14].mxu1 %vm371_vm15, %v3175_v29  ;;  %2397 = vmatprep.mubr.msk.f32.mxu0 %vm500_vm0, %v3175_v29  ;;  %v2873_v19 = vpack.c.bf16 %v1054_v14, %v1051_v45  ;;  %v1726_v45 = vld [vmem:[%s3925_s3 + $0x38] sm:$0xff] }
  0xd7   : > { %2461 = vmatprep.mubr.msk.f32.mxu1 %vm500_vm0, %v3175_v29  ;;  %v345_v32 = vpop.permute.xlu0 %344  ;;  %2932 = vmatpush3.bf16.msra.mxu1 %v2931_v15 }
  0xd8   : > { %v473_v35 = vpop.permute.xlu1 %472  ;;  %2852 = vmatpush1.bf16.msra.mxu0 %v2851_v18  ;;  %2934 = vmatprep.subr.bf16.mxu1 %v2933_v20  ;;  %vm373_vm3 = vcmp.eq.s32.totalorder %v3400_v2, %v345_v32  ;;  %v2871_v18 = vpack.c.bf16 %v1047_v57, %v1044_v6  ;;  %v1050_v20 = vld [vmem:[#allocation4 + $0x570] sm:$0xff]  ;;  %v1059_v32 = vld [vmem:[#allocation4 + $0x5b8] sm:$0xff] }
  0xd9   : > { %vm501_vm2 = vcmp.eq.s32.totalorder %v3400_v2, %v473_v35  ;;  %2398 = vmatmul.mubr.msk.f32.gmra.mrb[16].mxu0 %vm372_vm1, %v3175_v29  ;;  %2854 = vmatprep.subr.bf16.mxu0 %v2853_v24  ;;  %v1060_v24 = vld [vmem:[#allocation4 + $0x5c0] sm:$0xff]  ;;  %v2875_v30 = vpack.c.bf16 %v1053_v21, %v1050_v20  ;;  %v1066_v35 = vld [vmem:[#allocation4 + $0x5f0] sm:$0xff] }
  0xda   : > { %2462 = vmatmul.mubr.msk.f32.gmra.mrb[16].mxu1 %vm372_vm1, %v3175_v29  ;;  %2399 = vmatprep.mubr.msk.f32.mxu0 %vm501_vm2, %v3175_v29  ;;  %v2877_v16 = vpack.c.bf16 %v1060_v24, %v1057_v23  ;;  %v1725_v57 = vld [vmem:[%s3925_s3 + $0x30] sm:$0xff]  ;;  %v1730_v23 = vld [vmem:[%s3925_s3 + $0x58] sm:$0xff] }
  0xdb   : > { %2463 = vmatprep.mubr.msk.f32.mxu1 %vm501_vm2, %v3175_v29  ;;  %v348_v51 = vpop.permute.xlu0 %347  ;;  %2936 = vmatpush3.bf16.msra.mxu1 %v2935_v34  ;;  %v1063_v34 = vld [vmem:[#allocation4 + $0x5d8] sm:$0xff]  ;;  %v2961_v14 = vpack.c.bf16 %v1726_v45, %v1725_v57  ;;  %v1729_v21 = vld [vmem:[%s3925_s3 + $0x50] sm:$0xff] }
  0xdc   : > { %v476_v53 = vpop.permute.xlu1 %475  ;;  %2856 = vmatpush1.bf16.msra.mxu0 %v2855_v36  ;;  %2938 = vmatprep.subr.bf16.mxu1 %v2937_v39  ;;  %vm374_vm5 = vcmp.eq.s32.totalorder %v3400_v2, %v348_v51  ;;  %v2879_v39 = vpack.c.bf16 %v1059_v32, %v1056_v31  ;;  %v2881_v41 = vpack.c.bf16 %v1066_v35, %v1063_v34  ;;  %v1733_v34 = vld [vmem:[%s3925_s3 + $0x70] sm:$0xff]  ;;  %v1734_v35 = vld [vmem:[%s3925_s3 + $0x78] sm:$0xff] }
  0xdd   : > { %vm502_vm4 = vcmp.eq.s32.totalorder %v3400_v2, %v476_v53  ;;  %2400 = vmatmul.mubr.msk.f32.gmra.mrb[18].mxu0 %vm373_vm3, %v3175_v29  ;;  %2858 = vmatprep.subr.bf16.mxu0 %v2857_v43  ;;  %v1065_v43 = vld [vmem:[#allocation4 + $0x5e8] sm:$0xff] }
  0xde   : > { %2464 = vmatmul.mubr.msk.f32.gmra.mrb[18].mxu1 %vm373_vm3, %v3175_v29  ;;  %2401 = vmatprep.mubr.msk.f32.mxu0 %vm502_vm4, %v3175_v29  ;;  %v2883_v46 = vpack.c.bf16 %v1065_v43, %v1062_v42 }
  0xdf   : > { %2465 = vmatprep.mubr.msk.f32.mxu1 %vm502_vm4, %v3175_v29  ;;  %v351_v25 = vpop.permute.xlu0 %350  ;;  %2940 = vmatpush3.bf16.msra.mxu1 %v2939_v52 }
  0xe0   : > { %v479_v60 = vpop.permute.xlu1 %478  ;;  %2860 = vmatpush1.bf16.msra.mxu0 %v2859_v55  ;;  %2942 = vmatprep.subr.bf16.mxu1 %v2941_v58  ;;  %vm375_vm7 = vcmp.eq.s32.totalorder %v3400_v2, %v351_v25 }
  0xe1   : > { %vm503_vm6 = vcmp.eq.s32.totalorder %v3400_v2, %v479_v60  ;;  %2402 = vmatmul.mubr.msk.f32.gmra.mrb[20].mxu0 %vm374_vm5, %v3175_v29  ;;  %2862 = vmatprep.subr.bf16.mxu0 %v2861_v28 }
  0xe2   : > { %2466 = vmatmul.mubr.msk.f32.gmra.mrb[20].mxu1 %vm374_vm5, %v3175_v29  ;;  %2403 = vmatprep.mubr.msk.f32.mxu0 %vm503_vm6, %v3175_v29 }
  0xe3   : > { %2467 = vmatprep.mubr.msk.f32.mxu1 %vm503_vm6, %v3175_v29  ;;  %v354_v8 = vpop.permute.xlu0 %353  ;;  %2944 = vmatpush3.bf16.msra.mxu1 %v2943_v40 }
  0xe4   : > { %v482_v10 = vpop.permute.xlu1 %481  ;;  %2864 = vmatpush1.bf16.msra.mxu0 %v2863_v61  ;;  %2946 = vmatprep.subr.bf16.mxu1 %v2945_v37  ;;  %vm376_vm9 = vcmp.eq.s32.totalorder %v3400_v2, %v354_v8  ;;  %v2953_v8 = vpack.c.bf16 %v1722_v7, %v1721_v54 }
  0xe5   : > { %vm504_vm8 = vcmp.eq.s32.totalorder %v3400_v2, %v482_v10  ;;  %2404 = vmatmul.mubr.msk.f32.gmra.mrb[22].mxu0 %vm375_vm7, %v3175_v29  ;;  %2866 = vmatprep.subr.bf16.mxu0 %v2865_v0  ;;  %v2949_v0 = vpack.c.bf16 %v1720_v63, %v1719_v62  ;;  %v1723_v10 = vld [vmem:[%s3925_s3 + $0x20] sm:$0xff] }
  0xe6   : > { %2468 = vmatmul.mubr.msk.f32.gmra.mrb[22].mxu1 %vm375_vm7, %v3175_v29  ;;  %2405 = vmatprep.mubr.msk.f32.mxu0 %vm504_vm8, %v3175_v29 }
  0xe7   : > { %2469 = vmatprep.mubr.msk.f32.mxu1 %vm504_vm8, %v3175_v29  ;;  %v357_v15 = vpop.permute.xlu0 %356  ;;  %2948 = vmatpush3.bf16.msra.mxu1 %v2947_v9 }
  0xe8   : > { %v485_v17 = vpop.permute.xlu1 %484  ;;  %2868 = vmatpush1.bf16.msra.mxu0 %v2867_v12  ;;  %vm377_vm11 = vcmp.eq.s32.totalorder %v3400_v2, %v357_v15  ;;  %2950 = vmatprep.subr.bf16.mxu1 %v2949_v0  ;;  %v1724_v12 = vld [vmem:[%s3925_s3 + $0x28] sm:$0xff] }
  0xe9   : > { %vm505_vm10 = vcmp.eq.s32.totalorder %v3400_v2, %v485_v17  ;;  %2406 = vmatmul.mubr.msk.f32.gmra.mrb[24].mxu0 %vm376_vm9, %v3175_v29  ;;  %2870 = vmatprep.subr.bf16.mxu0 %v2869_v13  ;;  %v2957_v13 = vpack.c.bf16 %v1724_v12, %v1723_v10  ;;  %v1727_v17 = vld [vmem:[%s3925_s3 + $0x40] sm:$0xff] }
  0xea   : > { %2470 = vmatmul.mubr.msk.f32.gmra.mrb[24].mxu1 %vm376_vm9, %v3175_v29  ;;  %2407 = vmatprep.mubr.msk.f32.mxu0 %vm505_vm10, %v3175_v29 }
  0xeb   : > { %2471 = vmatprep.mubr.msk.f32.mxu1 %vm505_vm10, %v3175_v29  ;;  %v360_v26 = vpop.permute.xlu0 %359 }
  0xec   : > { %v488_v27 = vpop.permute.xlu1 %487  ;;  %2872 = vmatpush1.bf16.msra.mxu0 %v2871_v18  ;;  %vm378_vm13 = vcmp.eq.s32.totalorder %v3400_v2, %v360_v26  ;;  %v1728_v18 = vld [vmem:[%s3925_s3 + $0x48] sm:$0xff]  ;;  %v2969_v26 = vpack.c.bf16 %v1730_v23, %v1729_v21 }
  0xed   : > { %vm506_vm12 = vcmp.eq.s32.totalorder %v3400_v2, %v488_v27  ;;  %2408 = vmatmul.mubr.msk.f32.gmra.mrb[26].mxu0 %vm377_vm11, %v3175_v29  ;;  %2874 = vmatprep.subr.bf16.mxu0 %v2873_v19  ;;  %v2965_v20 = vpack.c.bf16 %v1728_v18, %v1727_v17  ;;  %v3718_v17 = vld [vmem:[%s3924_s2] ss:$0 sm:$0xff] }
  0xee   : > { %2472 = vmatmul.mubr.msk.f32.gmra.mrb[26].mxu1 %vm377_vm11, %v3175_v29  ;;  %2409 = vmatprep.mubr.msk.f32.mxu0 %vm506_vm12, %v3175_v29 }
  0xef   : > { %2473 = vmatprep.mubr.msk.f32.mxu1 %vm506_vm12, %v3175_v29  ;;  %v363_v36 = vpop.permute.xlu0 %362 }
  0xf0   : > { %v491_v38 = vpop.permute.xlu1 %490  ;;  %2876 = vmatpush1.bf16.msra.mxu0 %v2875_v30  ;;  %vm379_vm15 = vcmp.eq.s32.totalorder %v3400_v2, %v363_v36  ;;  %v1731_v30 = vld [vmem:[%s3925_s3 + $0x60] sm:$0xff] }
  0xf1   : > { %vm507_vm14 = vcmp.eq.s32.totalorder %v3400_v2, %v491_v38  ;;  %2410 = vmatmul.mubr.msk.f32.gmra.mrb[28].mxu0 %vm378_vm13, %v3175_v29  ;;  %2878 = vmatprep.subr.bf16.mxu0 %v2877_v16  ;;  %v1732_v16 = vld [vmem:[%s3925_s3 + $0x68] sm:$0xff] }
  0xf2   : > { %2474 = vmatmul.mubr.msk.f32.gmra.mrb[28].mxu1 %vm378_vm13, %v3175_v29  ;;  %2411 = vmatprep.mubr.msk.f32.mxu0 %vm507_vm14, %v3175_v29  ;;  %v2973_v32 = vpack.c.bf16 %v1732_v16, %v1731_v30 }
  0xf3   : > { %2475 = vmatprep.mubr.msk.f32.mxu1 %vm507_vm14, %v3175_v29 }
  0xf4   : > { %2880 = vmatpush1.bf16.msra.mxu0 %v2879_v39  ;;  %v708_v44 = vpop.permute.xlu0 %707 }
  0xf5   : > { %v702_v47 = vpop.permute.xlu1 %701  ;;  %2412 = vmatmul.mubr.msk.f32.gmra.mrb[30].mxu0 %vm379_vm15, %v3175_v29  ;;  %2882 = vmatprep.subr.bf16.mxu0 %v2881_v41  ;;  %vm750_vm3 = vcmp.eq.s32.totalorder %v3400_v2, %v708_v44 }
  0xf6   : > { %vm748_vm0 = vcmp.eq.s32.totalorder %v3400_v2, %v702_v47  ;;  %2476 = vmatmul.mubr.msk.f32.gmra.mrb[30].mxu1 %vm379_vm15, %v3175_v29 }
  0xf7   : > { %2413 = vmatprep.mubr.msk.f32.mxu0 %vm748_vm0, %v3175_v29  ;;  %2477 = vmatprep.mubr.msk.f32.mxu1 %vm748_vm0, %v3175_v29 }
  0xf8   : > { %2884 = vmatpush1.bf16.msra.mxu0 %v2883_v46 }
  0xf9   : > { %v705_v48 = vpop.permute.xlu1 %704  ;;  %v574_v50 = vpop.permute.xlu0 %573 }
  0xfa   : > { %vm749_vm1 = vcmp.eq.s32.totalorder %v3400_v2, %v705_v48  ;;  %vm620_vm2 = vcmp.eq.s32.totalorder %v3400_v2, %v574_v50 }
  0xfb   : > { %2414 = vmatmul.mubr.msk.f32.vlgmr.msra.gmra.mrb[0].mxu0 %vm620_vm2, %v3175_v29  ;;  %2478 = vmatmul.mubr.msk.f32.vlgmr.msra.gmra.mrb[32].mxu1 %vm620_vm2, %v3175_v29 }
  0xfc   : > { %2415 = vmatprep.mubr.msk.f32.mxu0 %vm749_vm1, %v3175_v29  ;;  %2479 = vmatprep.mubr.msk.f32.mxu1 %vm749_vm1, %v3175_v29 }
  0xfd   : > { %v583_v53 = vpop.permute.xlu0 %582  ;;  %2952 = vmatpush3.bf16.msra.mxu1 %v2949_v0 }
  0xfe   : > { %v577_v51 = vpop.permute.xlu1 %576  ;;  %vm623_vm6 = vcmp.eq.s32.totalorder %v3400_v2, %v583_v53  ;;  %2954 = vmatprep.subr.bf16.mxu1 %v2953_v8 }
  0xff   : > { %vm621_vm4 = vcmp.eq.s32.totalorder %v3400_v2, %v577_v51 }
 0x100   : > { %2416 = vmatmul.mubr.msk.f32.gmra.mrb[2].mxu0 %vm621_vm4, %v3175_v29  ;;  %2480 = vmatmul.mubr.msk.f32.gmra.mrb[34].mxu1 %vm621_vm4, %v3175_v29 }
 0x101   : > { %2417 = vmatprep.mubr.msk.f32.mxu0 %vm750_vm3, %v3175_v29  ;;  %2481 = vmatprep.mubr.msk.f32.mxu1 %vm750_vm3, %v3175_v29 }
 0x102   : > { %v580_v52 = vpop.permute.xlu1 %579  ;;  %v717_v56 = vpop.permute.xlu0 %716  ;;  %2956 = vmatpush3.bf16.msra.mxu1 %v2953_v8 }
 0x103   : > { %vm622_vm5 = vcmp.eq.s32.totalorder %v3400_v2, %v580_v52  ;;  %vm753_vm9 = vcmp.eq.s32.totalorder %v3400_v2, %v717_v56  ;;  %2958 = vmatprep.subr.bf16.mxu1 %v2957_v13 }
 0x104   : > { %2418 = vmatmul.mubr.msk.f32.gmra.mrb[4].mxu0 %vm622_vm5, %v3175_v29  ;;  %2482 = vmatmul.mubr.msk.f32.gmra.mrb[36].mxu1 %vm622_vm5, %v3175_v29 }
 0x106   : > { %v726_v1 = vpop.permute.xlu0 %725  ;;  %2960 = vmatpush3.bf16.msra.mxu1 %v2957_v13 }
 0x107   : > { %v711_v55 = vpop.permute.xlu1 %710  ;;  %vm756_vm15 = vcmp.eq.s32.totalorder %v3400_v2, %v726_v1  ;;  %2962 = vmatprep.subr.bf16.mxu1 %v2961_v14 }
 0x108   : > { %vm751_vm7 = vcmp.eq.s32.totalorder %v3400_v2, %v711_v55 }
 0x109   : > { %2419 = vmatprep.mubr.msk.f32.mxu0 %vm751_vm7, %v3175_v29  ;;  %2483 = vmatprep.mubr.msk.f32.mxu1 %vm751_vm7, %v3175_v29 }
 0x10a   : > { %2420 = vmatmul.mubr.msk.f32.gmra.mrb[6].mxu0 %vm623_vm6, %v3175_v29  ;;  %2484 = vmatmul.mubr.msk.f32.gmra.mrb[38].mxu1 %vm623_vm6, %v3175_v29 }
 0x10b   : > { %v714_v58 = vpop.permute.xlu1 %713  ;;  %v592_v4 = vpop.permute.xlu0 %591  ;;  %2964 = vmatpush3.bf16.msra.mxu1 %v2961_v14 }
 0x10c   : > { %vm752_vm8 = vcmp.eq.s32.totalorder %v3400_v2, %v714_v58  ;;  %vm626_vm12 = vcmp.eq.s32.totalorder %v3400_v2, %v592_v4  ;;  %2966 = vmatprep.subr.bf16.mxu1 %v2965_v20 }
 0x10d   : > { %2421 = vmatprep.mubr.msk.f32.mxu0 %vm752_vm8, %v3175_v29  ;;  %2485 = vmatprep.mubr.msk.f32.mxu1 %vm752_vm8, %v3175_v29 }
 0x10f   : > { %v601_v25 = vpop.permute.xlu0 %600  ;;  %2968 = vmatpush3.bf16.msra.mxu1 %v2965_v20 }
 0x110   : > { %v586_v59 = vpop.permute.xlu1 %585  ;;  %vm629_vm2 = vcmp.eq.s32.totalorder %v3400_v2, %v601_v25  ;;  %2970 = vmatprep.subr.bf16.mxu1 %v2969_v26 }
 0x111   : > { %vm624_vm10 = vcmp.eq.s32.totalorder %v3400_v2, %v586_v59 }
 0x112   : > { %2422 = vmatmul.mubr.msk.f32.gmra.mrb[8].mxu0 %vm624_vm10, %v3175_v29  ;;  %2486 = vmatmul.mubr.msk.f32.gmra.mrb[40].mxu1 %vm624_vm10, %v3175_v29 }
 0x113   : > { %2423 = vmatprep.mubr.msk.f32.mxu0 %vm753_vm9, %v3175_v29  ;;  %2487 = vmatprep.mubr.msk.f32.mxu1 %vm753_vm9, %v3175_v29 }
 0x114   : > { %v589_v28 = vpop.permute.xlu1 %588  ;;  %v735_v61 = vpop.permute.xlu0 %734  ;;  %2972 = vmatpush3.bf16.msra.mxu1 %v2969_v26 }
 0x115   : > { %vm625_vm11 = vcmp.eq.s32.totalorder %v3400_v2, %v589_v28  ;;  %vm759_vm5 = vcmp.eq.s32.totalorder %v3400_v2, %v735_v61  ;;  %2974 = vmatprep.subr.bf16.mxu1 %v2973_v32 }
 0x116   : > { %2424 = vmatmul.mubr.msk.f32.gmra.mrb[10].mxu0 %vm625_vm11, %v3175_v29  ;;  %2488 = vmatmul.mubr.msk.f32.gmra.mrb[42].mxu1 %vm625_vm11, %v3175_v29 }
 0x118   : > { %2976 = vmatpush3.bf16.msra.mxu1 %v2973_v32 }
 0x119   : > { %v720_v22 = vpop.permute.xlu1 %719  ;;  %v610_v5 = vpop.permute.xlu0 %609 }
 0x11a   : > { %vm754_vm13 = vcmp.eq.s32.totalorder %v3400_v2, %v720_v22  ;;  %vm632_vm8 = vcmp.eq.s32.totalorder %v3400_v2, %v610_v5 }
 0x11b   : > { %2425 = vmatprep.mubr.msk.f32.mxu0 %vm754_vm13, %v3175_v29  ;;  %2489 = vmatprep.mubr.msk.f32.mxu1 %vm754_vm13, %v3175_v29 }
 0x11c   : > { %2426 = vmatmul.mubr.msk.f32.gmra.mrb[12].mxu0 %vm626_vm12, %v3175_v29  ;;  %2490 = vmatmul.mubr.msk.f32.gmra.mrb[44].mxu1 %vm626_vm12, %v3175_v29 }
 0x11d   : > { %v723_v33 = vpop.permute.xlu1 %722 }
 0x11e   : > { %vm755_vm14 = vcmp.eq.s32.totalorder %v3400_v2, %v723_v33  ;;  %v744_v15 = vpop.permute.xlu0 %743 }
 0x11f   : > { %2427 = vmatprep.mubr.msk.f32.mxu0 %vm755_vm14, %v3175_v29  ;;  %2491 = vmatprep.mubr.msk.f32.mxu1 %vm755_vm14, %v3175_v29  ;;  %vm762_vm11 = vcmp.eq.s32.totalorder %v3400_v2, %v744_v15 }
 0x122   : > { %v595_v49 = vpop.permute.xlu1 %594 }
 0x123   : > { %vm627_vm0 = vcmp.eq.s32.totalorder %v3400_v2, %v595_v49  ;;  %v619_v27 = vpop.permute.xlu0 %618 }
 0x124   : > { %2428 = vmatmul.mubr.msk.f32.gmra.mrb[14].mxu0 %vm627_vm0, %v3175_v29  ;;  %2492 = vmatmul.mubr.msk.f32.gmra.mrb[46].mxu1 %vm627_vm0, %v3175_v29  ;;  %vm635_vm14 = vcmp.eq.s32.totalorder %v3400_v2, %v619_v27  ;;  %vm2200_vm0 = vcmask 7168  }
 0x125   : > { %2429 = vmatprep.mubr.msk.f32.mxu0 %vm756_vm15, %v3175_v29  ;;  %2493 = vmatprep.mubr.msk.f32.mxu1 %vm756_vm15, %v3175_v29 }
 0x126   : > { %v598_v11 = vpop.permute.xlu1 %597 }
 0x127   : > { %vm628_vm1 = vcmp.eq.s32.totalorder %v3400_v2, %v598_v11 }
 0x128   : > { %2430 = vmatmul.mubr.msk.f32.gmra.mrb[16].mxu0 %vm628_vm1, %v3175_v29  ;;  %2494 = vmatmul.mubr.msk.f32.gmra.mrb[48].mxu1 %vm628_vm1, %v3175_v29 }
 0x12b   : > { %v729_v40 = vpop.permute.xlu1 %728 }
 0x12c   : > { %vm757_vm3 = vcmp.eq.s32.totalorder %v3400_v2, %v729_v40 }
 0x12d   : > { %2431 = vmatprep.mubr.msk.f32.mxu0 %vm757_vm3, %v3175_v29  ;;  %2495 = vmatprep.mubr.msk.f32.mxu1 %vm757_vm3, %v3175_v29 }
 0x12e   : > { %2432 = vmatmul.mubr.msk.f32.gmra.mrb[18].mxu0 %vm629_vm2, %v3175_v29  ;;  %2496 = vmatmul.mubr.msk.f32.gmra.mrb[50].mxu1 %vm629_vm2, %v3175_v29 }
 0x12f   : > { %v732_v60 = vpop.permute.xlu1 %731 }
 0x130   : > { %vm758_vm4 = vcmp.eq.s32.totalorder %v3400_v2, %v732_v60 }
 0x131   : > { %2433 = vmatprep.mubr.msk.f32.mxu0 %vm758_vm4, %v3175_v29  ;;  %2497 = vmatprep.mubr.msk.f32.mxu1 %vm758_vm4, %v3175_v29 }
 0x134   : > { %v604_v37 = vpop.permute.xlu1 %603 }
 0x135   : > { %vm630_vm6 = vcmp.eq.s32.totalorder %v3400_v2, %v604_v37 }
 0x136   : > { %2434 = vmatmul.mubr.msk.f32.gmra.mrb[20].mxu0 %vm630_vm6, %v3175_v29  ;;  %2498 = vmatmul.mubr.msk.f32.gmra.mrb[52].mxu1 %vm630_vm6, %v3175_v29 }
 0x137   : > { %2435 = vmatprep.mubr.msk.f32.mxu0 %vm759_vm5, %v3175_v29  ;;  %2499 = vmatprep.mubr.msk.f32.mxu1 %vm759_vm5, %v3175_v29 }
 0x138   : > { %v607_v3 = vpop.permute.xlu1 %606 }
 0x139   : > { %vm631_vm7 = vcmp.eq.s32.totalorder %v3400_v2, %v607_v3 }
 0x13a   : > { %2436 = vmatmul.mubr.msk.f32.gmra.mrb[22].mxu0 %vm631_vm7, %v3175_v29  ;;  %2500 = vmatmul.mubr.msk.f32.gmra.mrb[54].mxu1 %vm631_vm7, %v3175_v29 }
 0x13d   : > { %v738_v9 = vpop.permute.xlu1 %737 }
 0x13e   : > { %vm760_vm9 = vcmp.eq.s32.totalorder %v3400_v2, %v738_v9 }
 0x13f   : > { %2437 = vmatprep.mubr.msk.f32.mxu0 %vm760_vm9, %v3175_v29  ;;  %2501 = vmatprep.mubr.msk.f32.mxu1 %vm760_vm9, %v3175_v29 }
 0x140   : > { %2438 = vmatmul.mubr.msk.f32.gmra.mrb[24].mxu0 %vm632_vm8, %v3175_v29  ;;  %2502 = vmatmul.mubr.msk.f32.gmra.mrb[56].mxu1 %vm632_vm8, %v3175_v29 }
 0x141   : > { %v741_v6 = vpop.permute.xlu1 %740 }
 0x142   : > { %vm761_vm10 = vcmp.eq.s32.totalorder %v3400_v2, %v741_v6 }
 0x143   : > { %2439 = vmatprep.mubr.msk.f32.mxu0 %vm761_vm10, %v3175_v29  ;;  %2503 = vmatprep.mubr.msk.f32.mxu1 %vm761_vm10, %v3175_v29 }
 0x147   : > { %v613_v19 = vpop.permute.xlu1 %612 }
 0x148   : > { %vm633_vm12 = vcmp.eq.s32.totalorder %v3400_v2, %v613_v19 }
 0x149   : > { %2440 = vmatmul.mubr.msk.f32.gmra.mrb[26].mxu0 %vm633_vm12, %v3175_v29  ;;  %2504 = vmatmul.mubr.msk.f32.gmra.mrb[58].mxu1 %vm633_vm12, %v3175_v29 }
 0x14a   : > { %2441 = vmatprep.mubr.msk.f32.mxu0 %vm762_vm11, %v3175_v29  ;;  %2505 = vmatprep.mubr.msk.f32.mxu1 %vm762_vm11, %v3175_v29 }
 0x14b   : > { %v616_v24 = vpop.permute.xlu1 %615 }
 0x14c   : > { %vm634_vm13 = vcmp.eq.s32.totalorder %v3400_v2, %v616_v24 }
 0x14d   : > { %2442 = vmatmul.mubr.msk.f32.gmra.mrb[28].mxu0 %vm634_vm13, %v3175_v29  ;;  %2506 = vmatmul.mubr.msk.f32.gmra.mrb[60].mxu1 %vm634_vm13, %v3175_v29 }
 0x150   : > { %v747_v31 = vpop.permute.xlu1 %746 }
 0x151   : > { %vm763_vm15 = vcmp.eq.s32.totalorder %v3400_v2, %v747_v31  ;;  %v2977_v2 = vpack.c.bf16 %v1734_v35, %v1733_v34 }
 0x152   : > { %2443 = vmatprep.mubr.msk.f32.mxu0 %vm763_vm15, %v3175_v29  ;;  %2507 = vmatprep.mubr.msk.f32.mxu1 %vm763_vm15, %v3175_v29 }
 0x153   : > { %2444 = vmatmul.mubr.msk.f32.gmra.mrb[30].mxu0 %vm635_vm14, %v3175_v29  ;;  %2508 = vmatmul.mubr.msk.f32.gmra.mrb[62].mxu1 %vm635_vm14, %v3175_v29 }
 0x154   : > { %2978 = vmatprep.subr.bf16.mxu1 %v2977_v2 }
 0x155   : > { %2980 = vmatpush3.bf16.msra.mxu1 %v2977_v2 }
 0x18d   : > { %v2541_v36 = vpop.f32.mrb[0].mxu1 }
 0x18e   : > { %v2542_v38 = vpop.f32.mrb[1].mxu1 }
 0x18f   : > { %v2543_v39 = vadd.f32 %v2542_v38, %v2541_v36 }
 0x191   : > { %v2544_v41 = vpop.f32.mrb[2].mxu1 }
 0x192   : > { %v2545_v42 = vpop.f32.mrb[3].mxu1 }
 0x193   : > { %v3685_v43 = vadd.f32 %v2545_v42, %v2544_v41 }
 0x195   : > { %v2547_v44 = vpop.f32.mrb[4].mxu1 }
 0x196   : > { %v2548_v46 = vpop.f32.mrb[5].mxu1 }
 0x197   : > { %v3687_v47 = vadd.f32 %v2548_v46, %v2547_v44 }
 0x199   : > { %v2550_v48 = vpop.f32.mrb[6].mxu1 }
 0x19a   : > { %v2551_v50 = vpop.f32.mrb[7].mxu1 }
 0x19b   : > { %v3689_v29 = vadd.f32 %v2551_v50, %v2550_v48 }
 0x19d   : > { %v2553_v51 = vpop.f32.mrb[8].mxu1 }
 0x19e   : > { %v2554_v52 = vpop.f32.mrb[9].mxu1 }
 0x19f   : > { %v3691_v53 = vadd.f32 %v2554_v52, %v2553_v51 }
 0x1a1   : > { %v2556_v55 = vpop.f32.mrb[10].mxu1 }
 0x1a2   : > { %v2557_v56 = vpop.f32.mrb[11].mxu1 }
 0x1a3   : > { %v3693_v58 = vadd.f32 %v2557_v56, %v2556_v55 }
 0x1a5   : > { %v2559_v59 = vpop.f32.mrb[12].mxu1 }
 0x1a6   : > { %v2560_v1 = vpop.f32.mrb[13].mxu1 }
 0x1a7   : > { %v3695_v28 = vadd.f32 %v2560_v1, %v2559_v59 }
 0x1a9   : > { %v2562_v4 = vpop.f32.mrb[14].mxu1 }
 0x1aa   : > { %v2563_v22 = vpop.f32.mrb[15].mxu1 }
 0x1ab   : > { %v3697_v33 = vadd.f32 %v2563_v22, %v2562_v4 }
 0x1ad   : > { %v2565_v49 = vpop.f32.mrb[16].mxu1 }
 0x1ae   : > { %v2566_v11 = vpop.f32.mrb[17].mxu1 }
 0x1af   : > { %v3699_v25 = vadd.f32 %v2566_v11, %v2565_v49 }
 0x1b1   : > { %v2568_v40 = vpop.f32.mrb[18].mxu1 }
 0x1b2   : > { %v2569_v60 = vpop.f32.mrb[19].mxu1 }
 0x1b3   : > { %v3701_v61 = vadd.f32 %v2569_v60, %v2568_v40 }
 0x1b5   : > { %v2571_v37 = vpop.f32.mrb[20].mxu1 }
 0x1b6   : > { %v2572_v62 = vpop.f32.mrb[21].mxu1 }
 0x1b7   : > { %v3703_v63 = vadd.f32 %v2572_v62, %v2571_v37 }
 0x1b9   : > { %v2574_v0 = vpop.f32.mrb[22].mxu1 }
 0x1ba   : > { %v2575_v3 = vpop.f32.mrb[23].mxu1 }
 0x1bb   : > { %v3705_v5 = vadd.f32 %v2575_v3, %v2574_v0 }
 0x1bd   : > { %v2577_v54 = vpop.f32.mrb[24].mxu1 }
 0x1be   : > { %v2578_v7 = vpop.f32.mrb[25].mxu1 }
 0x1bf   : > { %v3707_v8 = vadd.f32 %v2578_v7, %v2577_v54 }
 0x1c1   : > { %v2580_v9 = vpop.f32.mrb[26].mxu1 }
 0x1c2   : > { %v2581_v10 = vpop.f32.mrb[27].mxu1 }
 0x1c3   : > { %v3709_v12 = vadd.f32 %v2581_v10, %v2580_v9 }
 0x1c5   : > { %v2583_v13 = vpop.f32.mrb[28].mxu1 }
 0x1c6   : > { %v2584_v6 = vpop.f32.mrb[29].mxu1 }
 0x1c7   : > { %v3711_v57 = vadd.f32 %v2584_v6, %v2583_v13 }
 0x1c9   : > { %v2586_v45 = vpop.f32.mrb[30].mxu1 }
 0x1ca   : > { %v2587_v14 = vpop.f32.mrb[31].mxu1 }
 0x1cb   : > { %v3713_v15 = vadd.f32 %v2587_v14, %v2586_v45 }
 0x1ce   : > { %v1295_v18 = vpop.f32.mrb[0].mxu0  ;;  %v2621_v19 = vpop.f32.mrb[32].mxu1 }
 0x1cf   : > { %v1687_v20 = vadd.f32 %v3718_v17, %v1295_v18  ;;  %v1297_v21 = vpop.f32.mrb[1].mxu0  ;;  %v2622_v23 = vpop.f32.mrb[33].mxu1 }
 0x1d0   : > { %v1958_v24 = vmul.f32 %v1297_v21, %v1297_v21  ;;  %v2623_v26 = vadd.f32 %v2622_v23, %v2621_v19 }
 0x1d1   : > { %v1703_v27 = vmax.f32 %v1687_v20, 0.0 }
 0x1d2   : > { %1974 = vadd.xlane.f32.xlu0 %v1958_v24  ;;  %v1602_v30 = vadd.f32 %v2623_v26, %v2543_v39 }
 0x1d3   : > { %v1301_v16 = vpop.f32.mrb[2].mxu0  ;;  %v2624_v31 = vpop.f32.mrb[34].mxu1  ;;  %2733 = vmatprep.mubr.f32.mxu1 %v1703_v27 }
 0x1d4   : > { %v1688_v32 = vadd.f32 %v3718_v17, %v1301_v16  ;;  %v1303_v34 = vpop.f32.mrb[3].mxu0  ;;  %v2625_v35 = vpop.f32.mrb[35].mxu1 }
 0x1d5   : > { %v1959_v2 = vmul.f32 %v1303_v34, %v1303_v34  ;;  %v2626_v36 = vadd.f32 %v2625_v35, %v2624_v31 }
 0x1d6   : > { %v1704_v38 = vmax.f32 %v1688_v32, 0.0  ;;  %2022 = vadd.xlane.f32.xlu0 %v1602_v30 }
 0x1d7   : > { %v2627_v41 = vpop.f32.mrb[36].mxu1  ;;  %1976 = vadd.xlane.f32.xlu1 %v1959_v2  ;;  %v1307_v42 = vpop.f32.mrb[4].mxu0  ;;  %v1607_v44 = vadd.f32 %v2626_v36, %v3685_v43 }
 0x1d8   : > { %v1689_v46 = vadd.f32 %v3718_v17, %v1307_v42  ;;  %v1309_v48 = vpop.f32.mrb[5].mxu0  ;;  %v2628_v39 = vpop.f32.mrb[37].mxu1  ;;  %2734 = vmatmul.mubr.f32.vlgmr.msra.gmra.mrb[64].mxu1 %v1704_v38 }
 0x1d9   : > { %v1960_v50 = vmul.f32 %v1309_v48, %v1309_v48  ;;  %v2629_v51 = vadd.f32 %v2628_v39, %v2627_v41 }
 0x1da   : > { %v1705_v52 = vmax.f32 %v1689_v46, 0.0 }
 0x1db   : > { %2024 = vadd.xlane.f32.xlu1 %v1607_v44  ;;  %1978 = vadd.xlane.f32.xlu0 %v1960_v50  ;;  %v1612_v55 = vadd.f32 %v2629_v51, %v3687_v47 }
 0x1dc   : > { %2736 = vmatprep.mubr.f32.mxu1 %v1705_v52 }
 0x1dd   : > { %v1313_v56 = vpop.f32.mrb[6].mxu0  ;;  %v2630_v59 = vpop.f32.mrb[38].mxu1 }
 0x1de   : > { %v1690_v1 = vadd.f32 %v3718_v17, %v1313_v56  ;;  %v1315_v4 = vpop.f32.mrb[7].mxu0  ;;  %v2631_v22 = vpop.f32.mrb[39].mxu1 }
 0x1df   : > { %v1961_v43 = vmul.f32 %v1315_v4, %v1315_v4  ;;  %v2632_v49 = vadd.f32 %v2631_v22, %v2630_v59  ;;  %2026 = vadd.xlane.f32.xlu0 %v1612_v55 }
 0x1e0   : > { %v1706_v11 = vmax.f32 %v1690_v1, 0.0 }
 0x1e1   : > { %1980 = vadd.xlane.f32.xlu1 %v1961_v43  ;;  %v1617_v40 = vadd.f32 %v2632_v49, %v3689_v29 }
 0x1e2   : > { %2737 = vmatmul.mubr.f32.gmra.mrb[66].mxu1 %v1706_v11 }
 0x1e5   : > { %v2633_v60 = vpop.f32.mrb[40].mxu1  ;;  %2028 = vadd.xlane.f32.xlu1 %v1617_v40  ;;  %v1319_v37 = vpop.f32.mrb[8].mxu0 }
 0x1e6   : > { %v1691_v47 = vadd.f32 %v3718_v17, %v1319_v37  ;;  %v1321_v62 = vpop.f32.mrb[9].mxu0  ;;  %v2634_v0 = vpop.f32.mrb[41].mxu1 }
 0x1e7   : > { %v1962_v3 = vmul.f32 %v1321_v62, %v1321_v62  ;;  %v2635_v54 = vadd.f32 %v2634_v0, %v2633_v60 }
 0x1e8   : > { %v1707_v7 = vmax.f32 %v1691_v47, 0.0 }
 0x1e9   : > { %1982 = vadd.xlane.f32.xlu0 %v1962_v3  ;;  %v1325_v9 = vpop.f32.mrb[10].mxu0  ;;  %v2636_v10 = vpop.f32.mrb[42].mxu1  ;;  %v1622_v13 = vadd.f32 %v2635_v54, %v3691_v53 }
 0x1ea   : > { %v1692_v6 = vadd.f32 %v3718_v17, %v1325_v9  ;;  %v1327_v45 = vpop.f32.mrb[11].mxu0  ;;  %v2637_v29 = vpop.f32.mrb[43].mxu1  ;;  %2739 = vmatprep.mubr.f32.mxu1 %v1707_v7 }
 0x1eb   : > { %v1963_v14 = vmul.f32 %v1327_v45, %v1327_v45  ;;  %v2638_v18 = vadd.f32 %v2637_v29, %v2636_v10 }
 0x1ec   : > { %v1708_v19 = vmax.f32 %v1692_v6, 0.0 }
 0x1ed   : > { %2030 = vadd.xlane.f32.xlu0 %v1622_v13  ;;  %1984 = vadd.xlane.f32.xlu1 %v1963_v14  ;;  %v1627_v20 = vadd.f32 %v2638_v18, %v3693_v58 }
 0x1ee   : > { %2740 = vmatmul.mubr.f32.gmra.mrb[68].mxu1 %v1708_v19 }
 0x1ef   : > { %v1331_v21 = vpop.f32.mrb[12].mxu0  ;;  %v2639_v23 = vpop.f32.mrb[44].mxu1 }
 0x1f0   : > { %v1693_v24 = vadd.f32 %v3718_v17, %v1331_v21  ;;  %v1333_v26 = vpop.f32.mrb[13].mxu0  ;;  %v2640_v27 = vpop.f32.mrb[45].mxu1 }
 0x1f1   : > { %v1964_v53 = vmul.f32 %v1333_v26, %v1333_v26  ;;  %v2641_v30 = vadd.f32 %v2640_v27, %v2639_v23  ;;  %2032 = vadd.xlane.f32.xlu1 %v1627_v20 }
 0x1f2   : > { %v1709_v16 = vmax.f32 %v1693_v24, 0.0 }
 0x1f3   : > { %1986 = vadd.xlane.f32.xlu0 %v1964_v53  ;;  %v1632_v31 = vadd.f32 %v2641_v30, %v3695_v28 }
 0x1f4   : > { %2742 = vmatprep.mubr.f32.mxu1 %v1709_v16 }
 0x1f7   : > { %v2642_v32 = vpop.f32.mrb[46].mxu1  ;;  %2034 = vadd.xlane.f32.xlu0 %v1632_v31  ;;  %v1337_v34 = vpop.f32.mrb[14].mxu0 }
 0x1f8   : > { %v1694_v58 = vadd.f32 %v3718_v17, %v1337_v34  ;;  %v1339_v35 = vpop.f32.mrb[15].mxu0  ;;  %v2643_v2 = vpop.f32.mrb[47].mxu1 }
 0x1f9   : > { %v1965_v36 = vmul.f32 %v1339_v35, %v1339_v35  ;;  %v2644_v38 = vadd.f32 %v2643_v2, %v2642_v32 }
 0x1fa   : > { %v1710_v41 = vmax.f32 %v1694_v58, 0.0 }
 0x1fb   : > { %v2645_v42 = vpop.f32.mrb[48].mxu1  ;;  %1988 = vadd.xlane.f32.xlu1 %v1965_v36  ;;  %v1343_v44 = vpop.f32.mrb[16].mxu0  ;;  %v1637_v46 = vadd.f32 %v2644_v38, %v3697_v33 }
 0x1fc   : > { %v1695_v48 = vadd.f32 %v3718_v17, %v1343_v44  ;;  %v1345_v39 = vpop.f32.mrb[17].mxu0  ;;  %v2646_v28 = vpop.f32.mrb[49].mxu1  ;;  %2743 = vmatmul.mubr.f32.gmra.mrb[70].mxu1 %v1710_v41 }
 0x1fd   : > { %v1966_v50 = vmul.f32 %v1345_v39, %v1345_v39  ;;  %v2647_v51 = vadd.f32 %v2646_v28, %v2645_v42 }
 0x1fe   : > { %v1711_v52 = vmax.f32 %v1695_v48, 0.0 }
 0x1ff   : > { %2036 = vadd.xlane.f32.xlu1 %v1637_v46  ;;  %1990 = vadd.xlane.f32.xlu0 %v1966_v50  ;;  %v1642_v55 = vadd.f32 %v2647_v51, %v3699_v25 }
 0x200   : > { %2745 = vmatprep.mubr.f32.mxu1 %v1711_v52 }
 0x201   : > { %v1349_v56 = vpop.f32.mrb[18].mxu0  ;;  %v2648_v59 = vpop.f32.mrb[50].mxu1 }
 0x202   : > { %v1696_v1 = vadd.f32 %v3718_v17, %v1349_v56  ;;  %v1351_v4 = vpop.f32.mrb[19].mxu0  ;;  %v2649_v22 = vpop.f32.mrb[51].mxu1 }
 0x203   : > { %v1967_v33 = vmul.f32 %v1351_v4, %v1351_v4  ;;  %v2650_v43 = vadd.f32 %v2649_v22, %v2648_v59  ;;  %2038 = vadd.xlane.f32.xlu0 %v1642_v55 }
 0x204   : > { %v1712_v49 = vmax.f32 %v1696_v1, 0.0 }
 0x205   : > { %1992 = vadd.xlane.f32.xlu1 %v1967_v33  ;;  %v1647_v11 = vadd.f32 %v2650_v43, %v3701_v61 }
 0x206   : > { %2746 = vmatmul.mubr.f32.gmra.mrb[72].mxu1 %v1712_v49 }
 0x209   : > { %v2651_v40 = vpop.f32.mrb[52].mxu1  ;;  %2040 = vadd.xlane.f32.xlu1 %v1647_v11  ;;  %v1355_v60 = vpop.f32.mrb[20].mxu0 }
 0x20a   : > { %v1697_v25 = vadd.f32 %v3718_v17, %v1355_v60  ;;  %v1357_v37 = vpop.f32.mrb[21].mxu0  ;;  %v2652_v47 = vpop.f32.mrb[53].mxu1 }
 0x20b   : > { %v1968_v62 = vmul.f32 %v1357_v37, %v1357_v37  ;;  %v2653_v0 = vadd.f32 %v2652_v47, %v2651_v40 }
 0x20c   : > { %v1713_v3 = vmax.f32 %v1697_v25, 0.0 }
 0x20d   : > { %1994 = vadd.xlane.f32.xlu0 %v1968_v62  ;;  %v1361_v54 = vpop.f32.mrb[22].mxu0  ;;  %v2654_v7 = vpop.f32.mrb[54].mxu1  ;;  %v1652_v9 = vadd.f32 %v2653_v0, %v3703_v63 }
 0x20e   : > { %v1698_v10 = vadd.f32 %v3718_v17, %v1361_v54  ;;  %v1363_v13 = vpop.f32.mrb[23].mxu0  ;;  %v2655_v61 = vpop.f32.mrb[55].mxu1  ;;  %2748 = vmatprep.mubr.f32.mxu1 %v1713_v3 }
 0x20f   : > { %v1969_v6 = vmul.f32 %v1363_v13, %v1363_v13  ;;  %v2656_v45 = vadd.f32 %v2655_v61, %v2654_v7 }
 0x210   : > { %v1714_v29 = vmax.f32 %v1698_v10, 0.0 }
 0x211   : > { %2042 = vadd.xlane.f32.xlu0 %v1652_v9  ;;  %1996 = vadd.xlane.f32.xlu1 %v1969_v6  ;;  %v1657_v14 = vadd.f32 %v2656_v45, %v3705_v5 }
 0x212   : > { %2749 = vmatmul.mubr.f32.gmra.mrb[74].mxu1 %v1714_v29 }
 0x213   : > { %v1367_v18 = vpop.f32.mrb[24].mxu0  ;;  %v2657_v19 = vpop.f32.mrb[56].mxu1 }
 0x214   : > { %v1699_v20 = vadd.f32 %v3718_v17, %v1367_v18  ;;  %v1369_v21 = vpop.f32.mrb[25].mxu0  ;;  %v2658_v23 = vpop.f32.mrb[57].mxu1 }
 0x215   : > { %v1970_v63 = vmul.f32 %v1369_v21, %v1369_v21  ;;  %v2659_v24 = vadd.f32 %v2658_v23, %v2657_v19  ;;  %2044 = vadd.xlane.f32.xlu1 %v1657_v14 }
 0x216   : > { %v1715_v26 = vmax.f32 %v1699_v20, 0.0 }
 0x217   : > { %1998 = vadd.xlane.f32.xlu0 %v1970_v63  ;;  %v1662_v27 = vadd.f32 %v2659_v24, %v3707_v8 }
 0x218   : > { %2751 = vmatprep.mubr.f32.mxu1 %v1715_v26 }
 0x21b   : > { %2046 = vadd.xlane.f32.xlu0 %v1662_v27 }
 0x21c   : > { %v2660_v53 = vpop.f32.mrb[58].mxu1  ;;  %v1373_v30 = vpop.f32.mrb[26].mxu0 }
 0x21d   : > { %v1700_v5 = vadd.f32 %v3718_v17, %v1373_v30  ;;  %v1375_v16 = vpop.f32.mrb[27].mxu0  ;;  %v2661_v31 = vpop.f32.mrb[59].mxu1 }
 0x21e   : > { %v1971_v32 = vmul.f32 %v1375_v16, %v1375_v16  ;;  %v2662_v34 = vadd.f32 %v2661_v31, %v2660_v53 }
 0x21f   : > { %v1716_v58 = vmax.f32 %v1700_v5, 0.0 }
 0x220   : > { %v1667_v35 = vadd.f32 %v2662_v34, %v3709_v12  ;;  %2000 = vadd.xlane.f32.xlu1 %v1971_v32  ;;  %v1379_v2 = vpop.f32.mrb[28].mxu0  ;;  %v2663_v36 = vpop.f32.mrb[60].mxu1  ;;  %v3790_v32 = vld [vmem:[%s3926_s4] ss:$0 sm:$0xff] }
 0x221   : > { %v1701_v38 = vadd.f32 %v3718_v17, %v1379_v2  ;;  %v1381_v41 = vpop.f32.mrb[29].mxu0  ;;  %v2664_v8 = vpop.f32.mrb[61].mxu1  ;;  %2752 = vmatmul.mubr.f32.gmra.mrb[76].mxu1 %v1716_v58 }
 0x222   : > { %v1972_v42 = vmul.f32 %v1381_v41, %v1381_v41  ;;  %v2665_v44 = vadd.f32 %v2664_v8, %v2663_v36 }
 0x223   : > { %v1717_v46 = vmax.f32 %v1701_v38, 0.0  ;;  %v3797_v38 = vld [vmem:[%s3927_s5] ss:$0 sm:$0xff] }
 0x224   : > { %2048 = vadd.xlane.f32.xlu1 %v1667_v35  ;;  %2002 = vadd.xlane.f32.xlu0 %v1972_v42  ;;  %v1672_v48 = vadd.f32 %v2665_v44, %v3711_v57 }
 0x225   : > { %2754 = vmatprep.mubr.f32.mxu1 %v1717_v46 }
 0x226   : > { %v1385_v39 = vpop.f32.mrb[30].mxu0  ;;  %v2666_v28 = vpop.f32.mrb[62].mxu1 }
 0x227   : > { %v1702_v12 = vadd.f32 %v3718_v17, %v1385_v39  ;;  %v1387_v50 = vpop.f32.mrb[31].mxu0  ;;  %v2667_v51 = vpop.f32.mrb[63].mxu1 }
 0x228   : > { %v1973_v52 = vmul.f32 %v1387_v50, %v1387_v50  ;;  %v2668_v55 = vadd.f32 %v2667_v51, %v2666_v28  ;;  %2050 = vadd.xlane.f32.xlu0 %v1672_v48 }
 0x229   : > { %v1718_v56 = vmax.f32 %v1702_v12, 0.0 }
 0x22a   : > { %v1677_v59 = vadd.f32 %v2668_v55, %v3713_v15  ;;  %2004 = vadd.xlane.f32.xlu1 %v1973_v52 }
 0x22b   : > { %2755 = vmatmul.mubr.f32.gmra.mrb[78].mxu1 %v1718_v56 }
 0x22e   : > { %2052 = vadd.xlane.f32.xlu1 %v1677_v59 }
 0x25f   : > { %v3751_v1 = vpop.xlane.xlu0 %1974 }
 0x263   : > { %v3753_v4 = vpop.xlane.xlu0 %2022 }
 0x264   : > { %v3755_v57 = vpop.xlane.xlu1 %1976 }
 0x268   : > { %v3757_v22 = vpop.xlane.xlu0 %1978  ;;  %v3759_v17 = vpop.xlane.xlu1 %2024 }
 0x26c   : > { %v3761_v33 = vpop.xlane.xlu0 %2026 }
 0x26e   : > { %v3763_v43 = vpop.xlane.xlu1 %1980 }
 0x272   : > { %v3765_v15 = vpop.xlane.xlu1 %2028 }
 0x276   : > { %v1983_v49 = vpop.xlane.xlu0 %1982 }
 0x277   : > { %v2010_v11 = vmul.f32 0.5, %v1983_v49 }
 0x27a   : > { %v2031_v40 = vpop.xlane.xlu0 %2030  ;;  %v3769_v25 = vpop.xlane.xlu1 %1984 }
 0x27b   : > { %v3767_v60 = vadd.f32 %v2031_v40, %v2010_v11 }
 0x27e   : > { %v3771_v62 = vpop.xlane.xlu1 %2032 }
 0x280   : > { %v1987_v37 = vpop.xlane.xlu0 %1986 }
 0x281   : > { %v2012_v47 = vmul.f32 0.5, %v1987_v37 }
 0x284   : > { %v2035_v0 = vpop.xlane.xlu0 %2034 }
 0x285   : > { %v3773_v3 = vadd.f32 %v2035_v0, %v2012_v47 }
 0x288   : > { %v1989_v54 = vpop.xlane.xlu1 %1988 }
 0x289   : > { %v2013_v7 = vmul.f32 0.5, %v1989_v54 }
 0x28c   : > { %v2037_v9 = vpop.xlane.xlu1 %2036  ;;  %v1991_v10 = vpop.xlane.xlu0 %1990 }
 0x28d   : > { %v3775_v13 = vadd.f32 %v2037_v9, %v2013_v7  ;;  %v2014_v61 = vmul.f32 0.5, %v1991_v10 }
 0x290   : > { %v2039_v6 = vpop.xlane.xlu0 %2038 }
 0x291   : > { %v3777_v45 = vadd.f32 %v2039_v6, %v2014_v61 }
 0x292   : > { %v1993_v29 = vpop.xlane.xlu1 %1992 }
 0x293   : > { %v2015_v14 = vmul.f32 0.5, %v1993_v29 }
 0x296   : > { %v2041_v18 = vpop.xlane.xlu1 %2040 }
 0x297   : > { %v3779_v19 = vadd.f32 %v2041_v18, %v2015_v14 }
 0x29a   : > { %v1995_v20 = vpop.xlane.xlu0 %1994 }
 0x29b   : > { %v2016_v21 = vmul.f32 0.5, %v1995_v20 }
 0x29e   : > { %v1997_v23 = vpop.xlane.xlu1 %1996  ;;  %v2043_v63 = vpop.xlane.xlu0 %2042 }
 0x29f   : > { %v3781_v24 = vadd.f32 %v2043_v63, %v2016_v21  ;;  %v2017_v26 = vmul.f32 0.5, %v1997_v23 }
 0x2a2   : > { %v2045_v27 = vpop.xlane.xlu1 %2044 }
 0x2a3   : > { %v3783_v53 = vadd.f32 %v2045_v27, %v2017_v26 }
 0x2a4   : > { %v1999_v30 = vpop.xlane.xlu0 %1998 }
 0x2a5   : > { %v2018_v5 = vmul.f32 0.5, %v1999_v30 }
 0x2a8   : > { %v2047_v16 = vpop.xlane.xlu0 %2046 }
 0x2a9   : > { %v3785_v31 = vadd.f32 %v2047_v16, %v2018_v5 }
 0x2ab   : > { %v2735_v34 = vpop.f32.mrb[64].mxu1 }
 0x2ac   : > { %v1814_v58 = vadd.f32 %v2735_v34, %v3790_v32  ;;  %v1808_v35 = vpop.f32.mrb[65].mxu1 }
 0x2ad   : > { %v2001_v2 = vpop.xlane.xlu1 %2000  ;;  %v1809_v36 = vadd.f32 %v3790_v32, %v1808_v35 }
 0x2ae   : > { %v1888_v41 = vmax.f32 %v1814_v58, 0.0  ;;  %v2019_v42 = vmul.f32 0.5, %v2001_v2 }
 0x2af   : > { %v1887_v8 = vmax.f32 %v1809_v36, 0.0 }
 0x2b0   : > { %v1911_v44 = vmul.f32 %v3797_v38, %v1888_v41 }
 0x2b1   : > { %v1910_v46 = vmul.f32 %v3797_v38, %v1887_v8  ;;  %v2049_v48 = vpop.xlane.xlu1 %2048 }
 0x2b2   : > { %v3801_v39 = vadd.f32 %v2049_v48, %v2019_v42  ;;  %1928 = vadd.xlane.f32.xlu0 %v1911_v44 }
 0x2b3   : > { %1926 = vadd.xlane.f32.xlu1 %v1910_v46 }
 0x2b5   : > { %v2738_v28 = vpop.f32.mrb[66].mxu1 }
 0x2b6   : > { %v1824_v12 = vadd.f32 %v2738_v28, %v3790_v32  ;;  %v1818_v50 = vpop.f32.mrb[67].mxu1 }
 0x2b7   : > { %v1819_v51 = vadd.f32 %v3790_v32, %v1818_v50 }
 0x2b8   : > { %v1890_v52 = vmax.f32 %v1824_v12, 0.0 }
 0x2b9   : > { %v1889_v55 = vmax.f32 %v1819_v51, 0.0 }
 0x2ba   : > { %v1913_v56 = vmul.f32 %v3797_v38, %v1890_v52 }
 0x2bb   : > { %v1912_v59 = vmul.f32 %v3797_v38, %v1889_v55 }
 0x2bc   : > { %1932 = vadd.xlane.f32.xlu0 %v1913_v56 }
 0x2bd   : > { %1930 = vadd.xlane.f32.xlu1 %v1912_v59 }
 0x2c1   : > { %v2741_v49 = vpop.f32.mrb[68].mxu1 }
 0x2c2   : > { %v1834_v11 = vadd.f32 %v2741_v49, %v3790_v32  ;;  %v1828_v40 = vpop.f32.mrb[69].mxu1 }
 0x2c3   : > { %v1829_v37 = vadd.f32 %v3790_v32, %v1828_v40 }
 0x2c4   : > { %v1892_v47 = vmax.f32 %v1834_v11, 0.0 }
 0x2c5   : > { %v1891_v0 = vmax.f32 %v1829_v37, 0.0 }
 0x2c6   : > { %v1915_v54 = vmul.f32 %v3797_v38, %v1892_v47 }
 0x2c7   : > { %v1914_v7 = vmul.f32 %v3797_v38, %v1891_v0  ;;  %v3831_v0 = vpop.xlane.xlu0 %2002 }
 0x2c8   : > { %1936 = vadd.xlane.f32.xlu0 %v1915_v54  ;;  %v3833_v54 = vpop.xlane.xlu1 %2004 }
 0x2c9   : > { %1934 = vadd.xlane.f32.xlu1 %v1914_v7 }
 0x2cb   : > { %v3835_v7 = vpop.xlane.xlu0 %2050 }
 0x2cf   : > { %v2744_v9 = vpop.f32.mrb[70].mxu1 }
 0x2d0   : > { %v1844_v10 = vadd.f32 %v2744_v9, %v3790_v32  ;;  %v1838_v61 = vpop.f32.mrb[71].mxu1  ;;  %v2007_v9 = vmul.f32 0.5, %v3755_v57 }
 0x2d1   : > { %v1839_v6 = vadd.f32 %v3790_v32, %v1838_v61 }
 0x2d2   : > { %v1894_v29 = vmax.f32 %v1844_v10, 0.0  ;;  %v3838_v10 = vpop.xlane.xlu1 %2052  ;;  %v2055_v61 = vadd.f32 %v3759_v17, %v2007_v9 }
 0x2d3   : > { %v1893_v14 = vmax.f32 %v1839_v6, 0.0 }
 0x2d4   : > { %v1917_v18 = vmul.f32 %v3797_v38, %v1894_v29 }
 0x2d5   : > { %v1916_v20 = vmul.f32 %v3797_v38, %v1893_v14 }
 0x2d6   : > { %1940 = vadd.xlane.f32.xlu0 %v1917_v18 }
 0x2d7   : > { %1938 = vadd.xlane.f32.xlu1 %v1916_v20 }
 0x2d9   : > { %v2747_v21 = vpop.f32.mrb[72].mxu1 }
 0x2da   : > { %v1854_v23 = vadd.f32 %v2747_v21, %v3790_v32  ;;  %v1848_v63 = vpop.f32.mrb[73].mxu1 }
 0x2db   : > { %v1849_v26 = vadd.f32 %v3790_v32, %v1848_v63 }
 0x2dc   : > { %v1896_v27 = vmax.f32 %v1854_v23, 0.0 }
 0x2dd   : > { %v1895_v30 = vmax.f32 %v1849_v26, 0.0  ;;  %v2009_v26 = vmul.f32 0.5, %v3763_v43 }
 0x2de   : > { %v1919_v5 = vmul.f32 %v3797_v38, %v1896_v27 }
 0x2df   : > { %v1918_v16 = vmul.f32 %v3797_v38, %v1895_v30 }
 0x2e0   : > { %1944 = vadd.xlane.f32.xlu0 %v1919_v5 }
 0x2e1   : > { %1942 = vadd.xlane.f32.xlu1 %v1918_v16 }
 0x2e5   : > { %v2750_v34 = vpop.f32.mrb[74].mxu1 }
 0x2e6   : > { %v1864_v58 = vadd.f32 %v2750_v34, %v3790_v32  ;;  %v1858_v35 = vpop.f32.mrb[75].mxu1 }
 0x2e7   : > { %v1859_v2 = vadd.f32 %v3790_v32, %v1858_v35 }
 0x2e8   : > { %v1898_v36 = vmax.f32 %v1864_v58, 0.0 }
 0x2e9   : > { %v1897_v41 = vmax.f32 %v1859_v2, 0.0 }
 0x2ea   : > { %v1921_v8 = vmul.f32 %v3797_v38, %v1898_v36 }
 0x2eb   : > { %v1920_v42 = vmul.f32 %v3797_v38, %v1897_v41 }
 0x2ec   : > { %1948 = vadd.xlane.f32.xlu0 %v1921_v8 }
 0x2ed   : > { %1946 = vadd.xlane.f32.xlu1 %v1920_v42 }
 0x2f4   : > { %v2753_v44 = vpop.f32.mrb[76].mxu1 }
 0x2f5   : > { %v1874_v46 = vadd.f32 %v2753_v44, %v3790_v32  ;;  %v1868_v48 = vpop.f32.mrb[77].mxu1 }
 0x2f6   : > { %v1869_v28 = vadd.f32 %v3790_v32, %v1868_v48 }
 0x2f7   : > { %v1900_v12 = vmax.f32 %v1874_v46, 0.0 }
 0x2f8   : > { %v1899_v50 = vmax.f32 %v1869_v28, 0.0 }
 0x2f9   : > { %v1923_v51 = vmul.f32 %v3797_v38, %v1900_v12 }
 0x2fa   : > { %v1922_v52 = vmul.f32 %v3797_v38, %v1899_v50 }
 0x2fb   : > { %1952 = vadd.xlane.f32.xlu0 %v1923_v51 }
 0x2fc   : > { %1950 = vadd.xlane.f32.xlu1 %v1922_v52 }
 0x2fe   : > { %v2756_v55 = vpop.f32.mrb[78].mxu1 }
 0x2ff   : > { %v1884_v56 = vadd.f32 %v2756_v55, %v3790_v32  ;;  %v1878_v59 = vpop.f32.mrb[79].mxu1 }
 0x300   : > { %v1879_v49 = vadd.f32 %v3790_v32, %v1878_v59  ;;  %v2006_v32 = vmul.f32 0.5, %v3751_v1  ;;  %v2008_v1 = vmul.f32 0.5, %v3757_v22  ;;  %v2011_v22 = vmul.f32 0.5, %v3769_v25 }
 0x301   : > { %v1902_v11 = vmax.f32 %v1884_v56, 0.0 }
 0x302   : > { %v1901_v40 = vmax.f32 %v1879_v49, 0.0  ;;  %v2054_v6 = vadd.f32 %v3753_v4, %v2006_v32  ;;  %v2057_v4 = vadd.f32 %v3765_v15, %v2009_v26  ;;  %v2056_v17 = vadd.f32 %v3761_v33, %v2008_v1 }
 0x303   : > { %v1925_v37 = vmul.f32 %v3797_v38, %v1902_v11  ;;  %v2059_v33 = vadd.f32 %v3771_v62, %v2011_v22 }
 0x304   : > { %v1924_v47 = vmul.f32 %v3797_v38, %v1901_v40  ;;  %v3843_v38 = vstv %s2086_s20 }
 0x305   : > { %1956 = vadd.xlane.f32.xlu0 %v1925_v37 }
 0x306   : > { %1954 = vadd.xlane.f32.xlu1 %v1924_v47 }
 0x33f   : > { %v1929_v29 = vpop.xlane.xlu0 %1928 }
 0x340   : > { %v2071_v14 = vadd.f32 %v2055_v61, %v1929_v29  ;;  %v1927_v18 = vpop.xlane.xlu1 %1926 }
 0x341   : > { %v2070_v20 = vadd.f32 %v2054_v6, %v1927_v18 }
 0x342   : > { %v2089_v21 = vadd.f32 %v3843_v38, %v2071_v14 }
 0x343   : > { %v2088_v23 = vadd.f32 %v3843_v38, %v2070_v20 }
 0x344   : > { %v2364_v63 = vmul.f32 -1.442695, %v2089_v21 }
 0x345   : > { %v2363_v57 = vmul.f32 -1.442695, %v2088_v23 }
 0x346   : > { %3064 = vpow2.f32 %v2364_v63 }
 0x347   : > { %3066 = vpow2.f32 %v2363_v57 }
 0x349   : > { %v1933_v27 = vpop.xlane.xlu0 %1932 }
 0x34a   : > { %v2073_v30 = vadd.f32 %v2057_v4, %v1933_v27  ;;  %v1931_v5 = vpop.xlane.xlu1 %1930 }
 0x34b   : > { %v2072_v16 = vadd.f32 %v2056_v17, %v1931_v5 }
 0x34c   : > { %v2091_v34 = vadd.f32 %v3843_v38, %v2073_v30 }
 0x34d   : > { %v2090_v58 = vadd.f32 %v3843_v38, %v2072_v16 }
 0x34e   : > { %v2366_v35 = vmul.f32 -1.442695, %v2091_v34 }
 0x34f   : > { %v2365_v2 = vmul.f32 -1.442695, %v2090_v58 }
 0x350   : > { %v3065_v36 = vpop.eup %3064  ;;  %3068 = vpow2.f32 %v2366_v35 }
 0x351   : > { %v3067_v43 = vpop.eup %3066  ;;  %v2153_v41 = vadd.f32 1.0, %v3065_v36  ;;  %3070 = vpow2.f32 %v2365_v2 }
 0x352   : > { %v2152_v15 = vadd.f32 1.0, %v3067_v43 }
 0x353   : > { %3072 = vrcp.f32 %v2153_v41 }
 0x354   : > { %3074 = vrcp.f32 %v2152_v15 }
 0x355   : > { %v1937_v8 = vpop.xlane.xlu0 %1936 }
 0x356   : > { %v2075_v42 = vadd.f32 %v2059_v33, %v1937_v8  ;;  %v1935_v44 = vpop.xlane.xlu1 %1934 }
 0x357   : > { %v2074_v46 = vadd.f32 %v3767_v60, %v1935_v44 }
 0x358   : > { %v2093_v48 = vadd.f32 %v3843_v38, %v2075_v42 }
 0x359   : > { %v2092_v28 = vadd.f32 %v3843_v38, %v2074_v46 }
 0x35a   : > { %v3069_v12 = vpop.eup %3068  ;;  %v2368_v50 = vmul.f32 -1.442695, %v2093_v48 }
 0x35b   : > { %v3071_v51 = vpop.eup %3070  ;;  %v2155_v25 = vadd.f32 1.0, %v3069_v12  ;;  %v2367_v62 = vmul.f32 -1.442695, %v2092_v28 }
 0x35c   : > { %v2154_v52 = vadd.f32 1.0, %v3071_v51  ;;  %3076 = vpow2.f32 %v2368_v50 }
 0x35d   : > { %v3073_v60 = vpop.eup %3072  ;;  %3078 = vrcp.f32 %v2155_v25 }
 0x35e   : > { %v3075_v55 = vpop.eup %3074  ;;  %2202 = vst.msk [vmem:[%s3863_s25 + $0x8] sm:$0xff] %vm2200_vm0, %v3073_v60  ;;  %3080 = vrcp.f32 %v2154_v52  ;;  %v2021_v60 = vmul.f32 0.5, %v3833_v54 }
 0x35f   : > { %2201 = vst.msk [vmem:[%s3863_s25] sm:$0xff] %vm2200_vm0, %v3075_v55  ;;  %3082 = vpow2.f32 %v2367_v62 }
 0x360   : > { %v2069_v55 = vadd.f32 %v3838_v10, %v2021_v60 }
 0x363   : > { %v1941_v56 = vpop.xlane.xlu0 %1940 }
 0x364   : > { %v2077_v59 = vadd.f32 %v3775_v13, %v1941_v56  ;;  %v1939_v49 = vpop.xlane.xlu1 %1938 }
 0x365   : > { %v2076_v11 = vadd.f32 %v3773_v3, %v1939_v49 }
 0x366   : > { %v3077_v40 = vpop.eup %3076  ;;  %v2095_v37 = vadd.f32 %v3843_v38, %v2077_v59 }
 0x367   : > { %v3079_v47 = vpop.eup %3078  ;;  %v2157_v9 = vadd.f32 1.0, %v3077_v40  ;;  %v2094_v32 = vadd.f32 %v3843_v38, %v2076_v11 }
 0x368   : > { %v3081_v61 = vpop.eup %3080  ;;  %2204 = vst.msk [vmem:[%s3863_s25 + $0x18] sm:$0xff] %vm2200_vm0, %v3079_v47  ;;  %v2370_v6 = vmul.f32 -1.442695, %v2095_v37 }
 0x369   : > { %v3083_v29 = vpop.eup %3082  ;;  %2203 = vst.msk [vmem:[%s3863_s25 + $0x10] sm:$0xff] %vm2200_vm0, %v3081_v61  ;;  %3084 = vrcp.f32 %v2157_v9  ;;  %v2369_v13 = vmul.f32 -1.442695, %v2094_v32 }
 0x36a   : > { %v2156_v14 = vadd.f32 1.0, %v3083_v29  ;;  %3086 = vpow2.f32 %v2370_v6 }
 0x36b   : > { %3088 = vpow2.f32 %v2369_v13 }
 0x36c   : > { %3090 = vrcp.f32 %v2156_v14 }
 0x36d   : > { %v1945_v3 = vpop.xlane.xlu0 %1944 }
 0x36e   : > { %v2079_v18 = vadd.f32 %v3779_v19, %v1945_v3  ;;  %v1943_v20 = vpop.xlane.xlu1 %1942 }
 0x36f   : > { %v2078_v21 = vadd.f32 %v3777_v45, %v1943_v20 }
 0x370   : > { %v2097_v23 = vadd.f32 %v3843_v38, %v2079_v18 }
 0x371   : > { %v2096_v63 = vadd.f32 %v3843_v38, %v2078_v21 }
 0x372   : > { %v2372_v57 = vmul.f32 -1.442695, %v2097_v23 }
 0x373   : > { %v3085_v26 = vpop.eup %3084  ;;  %v2371_v1 = vmul.f32 -1.442695, %v2096_v63 }
 0x374   : > { %v3087_v4 = vpop.eup %3086  ;;  %2206 = vst.msk [vmem:[%s3863_s25 + $0x28] sm:$0xff] %vm2200_vm0, %v3085_v26  ;;  %3092 = vpow2.f32 %v2372_v57 }
 0x375   : > { %v3089_v17 = vpop.eup %3088  ;;  %v2159_v27 = vadd.f32 1.0, %v3087_v4  ;;  %3094 = vpow2.f32 %v2371_v1 }
 0x376   : > { %v3091_v30 = vpop.eup %3090  ;;  %v2158_v19 = vadd.f32 1.0, %v3089_v17 }
 0x377   : > { %2205 = vst.msk [vmem:[%s3863_s25 + $0x20] sm:$0xff] %vm2200_vm0, %v3091_v30  ;;  %3096 = vrcp.f32 %v2159_v27 }
 0x378   : > { %3098 = vrcp.f32 %v2158_v19 }
 0x379   : > { %v1949_v45 = vpop.xlane.xlu0 %1948 }
 0x37a   : > { %v2081_v5 = vadd.f32 %v3783_v53, %v1949_v45  ;;  %v1947_v16 = vpop.xlane.xlu1 %1946 }
 0x37b   : > { %v2080_v34 = vadd.f32 %v3781_v24, %v1947_v16 }
 0x37c   : > { %v2099_v58 = vadd.f32 %v3843_v38, %v2081_v5 }
 0x37d   : > { %v2098_v35 = vadd.f32 %v3843_v38, %v2080_v34 }
 0x37e   : > { %v3093_v2 = vpop.eup %3092  ;;  %v2374_v36 = vmul.f32 -1.442695, %v2099_v58 }
 0x37f   : > { %v3095_v43 = vpop.eup %3094  ;;  %v2161_v41 = vadd.f32 1.0, %v3093_v2  ;;  %v2373_v22 = vmul.f32 -1.442695, %v2098_v35 }
 0x380   : > { %v2160_v15 = vadd.f32 1.0, %v3095_v43  ;;  %3100 = vpow2.f32 %v2374_v36 }
 0x381   : > { %v3097_v33 = vpop.eup %3096  ;;  %3102 = vrcp.f32 %v2161_v41 }
 0x382   : > { %v3099_v8 = vpop.eup %3098  ;;  %2208 = vst.msk [vmem:[%s3863_s25 + $0x38] sm:$0xff] %vm2200_vm0, %v3097_v33  ;;  %3104 = vrcp.f32 %v2160_v15 }
 0x383   : > { %2207 = vst.msk [vmem:[%s3863_s25 + $0x30] sm:$0xff] %vm2200_vm0, %v3099_v8  ;;  %3106 = vpow2.f32 %v2373_v22 }
 0x388   : > { %v1953_v24 = vpop.xlane.xlu0 %1952 }
 0x389   : > { %v2083_v53 = vadd.f32 %v3801_v39, %v1953_v24  ;;  %v1951_v42 = vpop.xlane.xlu1 %1950 }
 0x38a   : > { %v3101_v44 = vpop.eup %3100  ;;  %v2082_v46 = vadd.f32 %v3785_v31, %v1951_v42  ;;  %v2020_v31 = vmul.f32 0.5, %v3831_v0 }
 0x38b   : > { %v3103_v48 = vpop.eup %3102  ;;  %v2163_v28 = vadd.f32 1.0, %v3101_v44  ;;  %v2101_v12 = vadd.f32 %v3843_v38, %v2083_v53 }
 0x38c   : > { %v3105_v50 = vpop.eup %3104  ;;  %2210 = vst.msk [vmem:[%s3863_s25 + $0x48] sm:$0xff] %vm2200_vm0, %v3103_v48  ;;  %v2100_v51 = vadd.f32 %v3843_v38, %v2082_v46  ;;  %v2068_v56 = vadd.f32 %v3835_v7, %v2020_v31 }
 0x38d   : > { %v3107_v25 = vpop.eup %3106  ;;  %2209 = vst.msk [vmem:[%s3863_s25 + $0x40] sm:$0xff] %vm2200_vm0, %v3105_v50  ;;  %3108 = vrcp.f32 %v2163_v28  ;;  %v2376_v62 = vmul.f32 -1.442695, %v2101_v12 }
 0x38e   : > { %v2162_v52 = vadd.f32 1.0, %v3107_v25  ;;  %v2375_v39 = vmul.f32 -1.442695, %v2100_v51 }
 0x38f   : > { %3110 = vpow2.f32 %v2376_v62 }
 0x390   : > { %3112 = vrcp.f32 %v2162_v52 }
 0x391   : > { %3114 = vpow2.f32 %v2375_v39 }
 0x392   : > { %v1957_v59 = vpop.xlane.xlu0 %1956 }
 0x393   : > { %v2085_v49 = vadd.f32 %v2069_v55, %v1957_v59  ;;  %v1955_v11 = vpop.xlane.xlu1 %1954 }
 0x394   : > { %v2084_v40 = vadd.f32 %v2068_v56, %v1955_v11 }
 0x395   : > { %v2103_v37 = vadd.f32 %v3843_v38, %v2085_v49 }
 0x396   : > { %v2102_v47 = vadd.f32 %v3843_v38, %v2084_v40 }
 0x397   : > { %v3109_v9 = vpop.eup %3108  ;;  %v2378_v54 = vmul.f32 -1.442695, %v2103_v37 }
 0x398   : > { %2212 = vst.msk [vmem:[%s3863_s25 + $0x58] sm:$0xff] %vm2200_vm0, %v3109_v9  ;;  %v2377_v0 = vmul.f32 -1.442695, %v2102_v47 }
 0x399   : > { %v3111_v32 = vpop.eup %3110  ;;  %3116 = vpow2.f32 %v2378_v54 }
 0x39a   : > { %v3113_v10 = vpop.eup %3112  ;;  %v2165_v61 = vadd.f32 1.0, %v3111_v32  ;;  %3118 = vpow2.f32 %v2377_v0 }
 0x39b   : > { %v3115_v7 = vpop.eup %3114  ;;  %2211 = vst.msk [vmem:[%s3863_s25 + $0x50] sm:$0xff] %vm2200_vm0, %v3113_v10 }
 0x39c   : > { %3120 = vrcp.f32 %v2165_v61  ;;  %v2164_v6 = vadd.f32 1.0, %v3115_v7 }
 0x39e   : > { %3122 = vrcp.f32 %v2164_v6 }
 0x3a3   : > { %v3117_v38 = vpop.eup %3116 }
 0x3a4   : > { %v3119_v29 = vpop.eup %3118  ;;  %v2167_v13 = vadd.f32 1.0, %v3117_v38 }
 0x3a5   : > { %v2166_v14 = vadd.f32 1.0, %v3119_v29 }
 0x3a6   : > { %v3121_v3 = vpop.eup %3120  ;;  %3124 = vrcp.f32 %v2167_v13 }
 0x3a7   : > { %2214 = vst.msk [vmem:[%s3863_s25 + $0x68] sm:$0xff] %vm2200_vm0, %v3121_v3  ;;  %3126 = vrcp.f32 %v2166_v14 }
 0x3a8   : > { %v3123_v18 = vpop.eup %3122 }
 0x3a9   : > { %2213 = vst.msk [vmem:[%s3863_s25 + $0x60] sm:$0xff] %vm2200_vm0, %v3123_v18 }
 0x3b0   : > { %v3125_v20 = vpop.eup %3124 }
 0x3b1   : > { %v3127_v21 = vpop.eup %3126  ;;  %2216 = vst.msk [vmem:[%s3863_s25 + $0x78] sm:$0xff] %vm2200_vm0, %v3125_v20 }
 0x3b2   : > { %2215 = vst.msk [vmem:[%s3863_s25 + $0x70] sm:$0xff] %vm2200_vm0, %v3127_v21 }
 0x3b3 PF: > { %s19_s26 = sadd.s32 1, %s3166_s26  }
 0x3b4   : > { %p16_p3 = scmp.ge.s32.totalorder %s19_s26, 4  }
 0x3b6   :  { %18 = sbr.rel (!%p16_p3) target bundleno = 3 (0x3), region = 83 }
 0x3bd   :  { %2239 = vsyncpa [#allocation5], 1 }
 0x3be   :  { %2241 = vsyncpa [#allocation5 + $0x1], 1 }

</bundles_post_ra>
